<compile_context>
chip_gen: v7x
topology: tpu7x:2x2x1
jax: 0.10.0
libtpu: 0.0.40
codegen_flags: <defaults>
</compile_context>

<pallas_src>
import functools

import jax
import jax.numpy as jnp
from jax import lax
from jax.experimental import pallas as pl
from jax.experimental.pallas import tpu as pltpu

NEG_SLOPE = 0.2       # leaky-relu negative slope of GAT attention
_NEG_INF = -1e30

_VMEM_SPEC = pl.BlockSpec(memory_space=pltpu.MemorySpace.VMEM)


# ----------------------------------------------------------------------------
# Host-side parameter preprocessing (trace-time, outside the kernel)
# ----------------------------------------------------------------------------
def _augment_gat_weights(w, a_l, a_r):
    """Fold the a_r attention projection into the layer weight and build a
    block-structured a_l matrix, so each GAT layer only needs:
      proj    = x @ w_aug          (features + one `er` column per head)
      el_rows = a_l_big (.) feat   (all heads in one dot, result as rows)
    instead of two tiny dots per head."""
    nhead, head_dim = a_l.shape
    w_er = jnp.concatenate(
        [w[:, h * head_dim:(h + 1) * head_dim] @ a_r[h].reshape(head_dim, 1)
         for h in range(nhead)], axis=1)                     # (in_dim, H)
    w_aug = jnp.concatenate([w, w_er], axis=1)               # (in_dim, H*D + H)
    al_big = jnp.zeros((nhead, nhead * head_dim), jnp.float32)
    for h in range(nhead):
        al_big = al_big.at[h, h * head_dim:(h + 1) * head_dim].set(a_l[h])
    return w_aug, al_big


def _pack_params(named_pieces):
    """Pack all small parameter tensors into a single bf16 slab (one DMA
    instead of ~11).  Every piece is padded to a multiple of 16 rows so each
    static in-kernel slice starts on a bf16 (16,128) tile boundary."""
    width = max(int(a.shape[1]) for _, a in named_pieces)
    layout, blocks, row = {}, [], 0
    for name, a in named_pieces:
        a = jnp.asarray(a, jnp.float32)
        nr, nc = a.shape
        pad_r = (-nr) % 16
        blocks.append(jnp.pad(a, ((0, pad_r), (0, width - nc))))
        layout[name] = (row, nr, nc)
        row += nr + pad_r
    slab = jnp.concatenate(blocks, axis=0).astype(jnp.bfloat16)
    return slab, layout


# ----------------------------------------------------------------------------
# One DGL-style GATConv on VMEM-resident values (inside the fused kernel)
# ----------------------------------------------------------------------------
def _gat_layer(x_b16, w_aug, al_big, adj_bias, *, nhead, head_dim, apply_act):
    hd = nhead * head_dim
    # One MXU op: projected features + a_r attention logits for every head.
    proj = jnp.dot(x_b16, w_aug, preferred_element_type=jnp.float32)  # (N,HD+H)
    feat = proj[:, :hd]                                               # (N, HD)
    er = proj[:, hd:hd + nhead]                                       # (N, H)
    feat_b16 = feat.astype(jnp.bfloat16)
    # One MXU op: a_l logits for ALL heads, laid out as rows over src nodes.
    el_rows = lax.dot_general(al_big, feat_b16, (((1,), (1,)), ((), ())),
                              preferred_element_type=jnp.float32)     # (H, N)
    outs = []
    for h in range(nhead):                                            # static
        e = el_rows[h:h + 1, :] + er[:, h:h + 1]   # e[dst,src]=el[src]+er[dst]
        e = jnp.where(e > 0, e, NEG_SLOPE * e)     # leaky relu (f32, v5e safe)
        e = e + adj_bias                           # hoisted -1e30 edge mask
        e = e - jnp.max(e, axis=-1, keepdims=True)
        p = jnp.exp(e)                             # non-edges underflow to 0
        # Self-loops guarantee denom >= 1; guard kept for robustness.
        denom = jnp.maximum(jnp.sum(p, axis=-1, keepdims=True), 1e-20)
        attn = p * pl.reciprocal(denom, approx=True)                  # EUP slot
        agg = jnp.dot(attn.astype(jnp.bfloat16),
                      feat_b16[:, h * head_dim:(h + 1) * head_dim],
                      preferred_element_type=jnp.float32)             # (N, D)
        if apply_act:
            agg = jnp.maximum(agg, 0.0)                               # relu
        outs.append(agg)
    return outs[0] if nhead == 1 else jnp.concatenate(outs, axis=-1)


# ----------------------------------------------------------------------------
# Fused forward kernel: mask -> encoder (2x GAT) -> linear -> re-mask
#                       -> decoder (1x GAT) -> sce loss
# ----------------------------------------------------------------------------
def _fused_forward_kernel(x_ref, mask_ref, bias_ref, slab_ref, loss_ref,
                          *, layout, nhead, head_dim, nhead_d, head_dim_d,
                          inv_num_mask):
    def piece(name):                      # static slab slices (ref.at is free)
        r0, nr, nc = layout[name]
        return slab_ref[r0:r0 + nr, 0:nc]

    x = x_ref[...]                        # (N, F) original features, f32
    m = mask_ref[...]                     # (N, 1), 1.0 = masked node
    bias = bias_ref[...]                  # (N, N) additive edge bias (0/-1e30)

    # encoding_mask_noise (replace_rate = 0): masked rows <- enc_mask_token.
    tok = piece("token").astype(jnp.float32)
    use_x = x * (1.0 - m) + m * tok
    h0 = use_x.astype(jnp.bfloat16)       # single bf16 cast for the MXU chain

    # --- GAT encoder: 2 layers, relu activation (encoding=True) ---
    h1 = _gat_layer(h0, piece("w1"), piece("al1"), bias,
                    nhead=nhead, head_dim=head_dim, apply_act=True)
    h2 = _gat_layer(h1.astype(jnp.bfloat16), piece("w2"), piece("al2"), bias,
                    nhead=nhead, head_dim=head_dim, apply_act=True)

    # --- encoder_to_decoder (bias-free linear) + re-mask ---
    rep = jnp.dot(h2.astype(jnp.bfloat16), piece("we2d"),
                  preferred_element_type=jnp.float32)
    rep = rep * (1.0 - m)

    # --- GAT decoder: 1 layer, 1 head, no activation ---
    recon = _gat_layer(rep.astype(jnp.bfloat16), piece("wd"), piece("ald"),
                       bias, nhead=nhead_d, head_dim=head_dim_d,
                       apply_act=False)                              # (N, F)

    # --- sce loss on masked nodes: mean((1 - cos(recon, x))^alpha), alpha=2 ---
    eps = 1e-12
    xr_n = recon * lax.rsqrt(
        jnp.maximum(jnp.sum(recon * recon, -1, keepdims=True), eps * eps))
    xi_n = x * lax.rsqrt(
        jnp.maximum(jnp.sum(x * x, -1, keepdims=True), eps * eps))
    cos = jnp.sum(xr_n * xi_n, axis=-1, keepdims=True)               # (N, 1)
    d = 1.0 - cos
    loss_ref[...] = jnp.sum(d * d * m, axis=0, keepdims=True) * inv_num_mask


def ini_model_forward(params, adj, x, mask, num_mask):
    (w1, a1l, a1r), (w2, a2l, a2r) = params["encoder"]
    wd, adl, adr = params["decoder"]
    nhead, head_dim = a1l.shape
    nhead_d, head_dim_d = adl.shape

    # Host-side (trace-time) weight folding + packing into one bf16 slab.
    w1_aug, al1_big = _augment_gat_weights(w1, a1l, a1r)
    w2_aug, al2_big = _augment_gat_weights(w2, a2l, a2r)
    wd_aug, ald_big = _augment_gat_weights(wd, adl, adr)
    slab, layout = _pack_params([
        ("w1", w1_aug), ("w2", w2_aug), ("we2d", params["enc2dec_w"]),
        ("wd", wd_aug), ("al1", al1_big), ("al2", al2_big),
        ("ald", ald_big), ("token", params["enc_mask_token"])])

    # Additive edge bias precomputed once on the host (adj never enters VMEM).
    adj_bias = jnp.where(adj > 0.0, 0.0, _NEG_INF).astype(jnp.float32)

    kern = functools.partial(
        _fused_forward_kernel, layout=layout,
        nhead=nhead, head_dim=head_dim,
        nhead_d=nhead_d, head_dim_d=head_dim_d,
        inv_num_mask=1.0 / float(num_mask))

    loss = pl.pallas_call(
        kern,
        out_shape=jax.ShapeDtypeStruct((1, 1), jnp.float32),
        in_specs=[_VMEM_SPEC] * 4,
        out_specs=_VMEM_SPEC,
    )(x, mask, adj_bias, slab)
    return loss[0, 0]


# ----------------------------------------------------------------------------
# deterministic parameter / input construction
# ----------------------------------------------------------------------------
def _glorot(key, shape):
    fan_in, fan_out = shape[0], shape[-1]
    std = (2.0 / (fan_in + fan_out)) ** 0.5
    return std * jax.random.normal(key, shape, dtype=jnp.float32)


def make_params(key, num_features=16, hidden=32, nlayers=2, heads=2,
                num_out_heads=1):
    enc_hidden = hidden // heads          # 16
    keys = jax.random.split(key, 16)
    ki = iter(range(16))

    encoder = []
    in_dim = num_features
    for _ in range(nlayers):
        w = _glorot(keys[next(ki)], (in_dim, heads * enc_hidden))
        al = _glorot(keys[next(ki)], (heads, enc_hidden))
        ar = _glorot(keys[next(ki)], (heads, enc_hidden))
        encoder.append((w, al, ar))
        in_dim = heads * enc_hidden       # = hidden

    enc2dec_w = _glorot(keys[next(ki)], (hidden, hidden))

    # decoder: 1 GAT layer, hidden -> num_features, num_out_heads heads
    wd = _glorot(keys[next(ki)], (hidden, num_out_heads * num_features))
    ald = _glorot(keys[next(ki)], (num_out_heads, num_features))
    ard = _glorot(keys[next(ki)], (num_out_heads, num_features))

    return {
        "enc_mask_token": jnp.zeros((1, num_features), jnp.float32),
        "encoder": encoder,
        "enc2dec_w": enc2dec_w,
        "decoder": (wd, ald, ard),
    }


def make_graph(n_nodes):
    # deterministic ring graph with self-loops, dense adjacency adj[dst, src]
    idx = jnp.arange(n_nodes)
    adj = jnp.zeros((n_nodes, n_nodes), jnp.float32)
    adj = adj.at[idx, idx].set(1.0)
    adj = adj.at[idx, (idx + 1) % n_nodes].set(1.0)
    adj = adj.at[idx, (idx - 1) % n_nodes].set(1.0)
    return adj


if __name__ == "__main__":
    N, F, HIDDEN, HEADS, NLAYERS, NOUT_HEADS = 64, 16, 32, 2, 2, 1
    MASK_RATE = 0.3

    key = jax.random.PRNGKey(0)
    k_param, k_x, k_perm = jax.random.split(key, 3)

    params = make_params(k_param, num_features=F, hidden=HIDDEN,
                         nlayers=NLAYERS, heads=HEADS,
                         num_out_heads=NOUT_HEADS)
    adj = make_graph(N)
    x = jax.random.normal(k_x, (N, F), dtype=jnp.float32)

    # torch.randperm-style node masking -> dense (N,1) multiplicative mask.
    perm = jax.random.permutation(k_perm, N)
    num_mask = int(MASK_RATE * N)
    mask = jnp.zeros((N,), jnp.float32).at[perm[:num_mask]].set(1.0)
    mask = mask.reshape(N, 1)

    loss = ini_model_forward(params, adj, x, mask, num_mask)
    loss = jax.block_until_ready(loss)
    assert jnp.isfinite(loss), "loss is not finite"
    print("KERNEL_OK")
</pallas_src>

<mosaic_0001>
module attributes {stable_mosaic.version = 11 : i64} {
  func.func @_fused_forward_kernel(%arg0: memref<64x16xf32, #tpu.memory_space<vmem>>, %arg1: memref<64x1xf32, #tpu.memory_space<vmem>>, %arg2: memref<64x64xf32, #tpu.memory_space<vmem>>, %arg3: memref<176x34xbf16, #tpu.memory_space<vmem>>, %arg4: memref<1x1xf32, #tpu.memory_space<vmem>>) attributes {dimension_semantics = [], scalar_prefetch = 0 : i64, scratch_operands = 0 : i64, tpu.core_type = #tpu.core_type<tc>} {
    %c0 = arith.constant 0 : index
    %c0_0 = arith.constant 0 : index
    %0 = vector.load %arg0[%c0, %c0_0] : memref<64x16xf32, #tpu.memory_space<vmem>>, vector<64x16xf32>
    %c0_1 = arith.constant 0 : index
    %c0_2 = arith.constant 0 : index
    %1 = vector.load %arg1[%c0_1, %c0_2] : memref<64x1xf32, #tpu.memory_space<vmem>>, vector<64x1xf32>
    %c0_3 = arith.constant 0 : index
    %c0_4 = arith.constant 0 : index
    %2 = vector.load %arg2[%c0_3, %c0_4] : memref<64x64xf32, #tpu.memory_space<vmem>>, vector<64x64xf32>
    %c160 = arith.constant 160 : index
    %c0_5 = arith.constant 0 : index
    %3 = vector.load %arg3[%c160, %c0_5] : memref<176x34xbf16, #tpu.memory_space<vmem>>, vector<1x16xbf16>
    %4 = arith.extf %3 : vector<1x16xbf16> to vector<1x16xf32>
    %cst = arith.constant 1.000000e+00 : f32
    %5 = vector.broadcast %cst : f32 to vector<64x1xf32>
    %6 = arith.subf %5, %1 : vector<64x1xf32>
    %7 = vector.broadcast %6 : vector<64x1xf32> to vector<64x16xf32>
    %8 = arith.mulf %0, %7 : vector<64x16xf32>
    %9 = vector.broadcast %1 : vector<64x1xf32> to vector<64x16xf32>
    %10 = vector.broadcast %4 : vector<1x16xf32> to vector<64x16xf32>
    %11 = arith.mulf %9, %10 : vector<64x16xf32>
    %12 = arith.addf %8, %11 : vector<64x16xf32>
    %13 = arith.truncf %12 : vector<64x16xf32> to vector<64x16xbf16>
    %c0_6 = arith.constant 0 : index
    %c0_7 = arith.constant 0 : index
    %14 = vector.load %arg3[%c0_6, %c0_7] : memref<176x34xbf16, #tpu.memory_space<vmem>>, vector<16x34xbf16>
    %c112 = arith.constant 112 : index
    %c0_8 = arith.constant 0 : index
    %15 = vector.load %arg3[%c112, %c0_8] : memref<176x34xbf16, #tpu.memory_space<vmem>>, vector<2x32xbf16>
    %cst_9 = arith.constant dense<0.000000e+00> : vector<64x34xf32>
    %16 = tpu.matmul %13, %14, %cst_9 {dimension_numbers = #tpu.dot_dimension_numbers<[1], [0], [0], [1], [0, 0, 1, 1], [], []>} : vector<64x16xbf16>, vector<16x34xbf16>, vector<64x34xf32> -> vector<64x34xf32>
    %17 = vector.extract_strided_slice %16 {offsets = [0, 0], sizes = [64, 32], strides = [1, 1]} : vector<64x34xf32> to vector<64x32xf32>
    %18 = vector.extract_strided_slice %16 {offsets = [0, 32], sizes = [64, 2], strides = [1, 1]} : vector<64x34xf32> to vector<64x2xf32>
    %19 = arith.truncf %17 : vector<64x32xf32> to vector<64x32xbf16>
    %cst_10 = arith.constant dense<0.000000e+00> : vector<2x64xf32>
    %20 = tpu.matmul %15, %19, %cst_10 {dimension_numbers = #tpu.dot_dimension_numbers<[1], [1], [0], [0], [0, 0, 1, 0], [], []>} : vector<2x32xbf16>, vector<64x32xbf16>, vector<2x64xf32> -> vector<2x64xf32>
    %21 = vector.extract_strided_slice %20 {offsets = [0, 0], sizes = [1, 64], strides = [1, 1]} : vector<2x64xf32> to vector<1x64xf32>
    %22 = vector.extract_strided_slice %18 {offsets = [0, 0], sizes = [64, 1], strides = [1, 1]} : vector<64x2xf32> to vector<64x1xf32>
    %23 = vector.broadcast %21 : vector<1x64xf32> to vector<64x64xf32>
    %24 = vector.broadcast %22 : vector<64x1xf32> to vector<64x64xf32>
    %25 = arith.addf %23, %24 : vector<64x64xf32>
    %cst_11 = arith.constant 0.000000e+00 : f32
    %26 = vector.broadcast %cst_11 : f32 to vector<64x64xf32>
    %27 = arith.cmpf ogt, %25, %26 : vector<64x64xf32>
    %cst_12 = arith.constant 2.000000e-01 : f32
    %28 = vector.broadcast %cst_12 : f32 to vector<64x64xf32>
    %29 = arith.mulf %28, %25 : vector<64x64xf32>
    %30 = arith.select %27, %25, %29 : vector<64x64xi1>, vector<64x64xf32>
    %31 = arith.addf %30, %2 : vector<64x64xf32>
    %cst_13 = arith.constant dense<0xFF800000> : vector<64xf32>
    %32 = vector.multi_reduction <maximumf>, %31, %cst_13 [1] : vector<64x64xf32> to vector<64xf32>
    %33 = vector.shape_cast %32 : vector<64xf32> to vector<64x1xf32>
    %34 = vector.broadcast %33 : vector<64x1xf32> to vector<64x64xf32>
    %35 = arith.subf %31, %34 : vector<64x64xf32>
    %36 = math.exp %35 : vector<64x64xf32>
    %cst_14 = arith.constant dense<0.000000e+00> : vector<64xf32>
    %37 = vector.multi_reduction <add>, %36, %cst_14 [1] : vector<64x64xf32> to vector<64xf32>
    %38 = vector.shape_cast %37 : vector<64xf32> to vector<64x1xf32>
    %cst_15 = arith.constant 9.99999968E-21 : f32
    %39 = vector.broadcast %cst_15 : f32 to vector<64x1xf32>
    %40 = arith.maximumf %38, %39 : vector<64x1xf32>
    %41 = tpu.reciprocal %40 {approx = true} : vector<64x1xf32> -> vector<64x1xf32>
    %42 = vector.broadcast %41 : vector<64x1xf32> to vector<64x64xf32>
    %43 = arith.mulf %36, %42 : vector<64x64xf32>
    %44 = arith.truncf %43 : vector<64x64xf32> to vector<64x64xbf16>
    %45 = vector.extract_strided_slice %19 {offsets = [0, 0], sizes = [64, 16], strides = [1, 1]} : vector<64x32xbf16> to vector<64x16xbf16>
    %cst_16 = arith.constant dense<0.000000e+00> : vector<64x16xf32>
    %46 = tpu.matmul %44, %45, %cst_16 {dimension_numbers = #tpu.dot_dimension_numbers<[1], [0], [0], [1], [0, 0, 1, 1], [], []>} : vector<64x64xbf16>, vector<64x16xbf16>, vector<64x16xf32> -> vector<64x16xf32>
    %cst_17 = arith.constant 0.000000e+00 : f32
    %47 = vector.broadcast %cst_17 : f32 to vector<64x16xf32>
    %48 = arith.maximumf %46, %47 : vector<64x16xf32>
    %49 = vector.extract_strided_slice %20 {offsets = [1, 0], sizes = [1, 64], strides = [1, 1]} : vector<2x64xf32> to vector<1x64xf32>
    %50 = vector.extract_strided_slice %18 {offsets = [0, 1], sizes = [64, 1], strides = [1, 1]} : vector<64x2xf32> to vector<64x1xf32>
    %51 = vector.broadcast %49 : vector<1x64xf32> to vector<64x64xf32>
    %52 = vector.broadcast %50 : vector<64x1xf32> to vector<64x64xf32>
    %53 = arith.addf %51, %52 : vector<64x64xf32>
    %cst_18 = arith.constant 0.000000e+00 : f32
    %54 = vector.broadcast %cst_18 : f32 to vector<64x64xf32>
    %55 = arith.cmpf ogt, %53, %54 : vector<64x64xf32>
    %cst_19 = arith.constant 2.000000e-01 : f32
    %56 = vector.broadcast %cst_19 : f32 to vector<64x64xf32>
    %57 = arith.mulf %56, %53 : vector<64x64xf32>
    %58 = arith.select %55, %53, %57 : vector<64x64xi1>, vector<64x64xf32>
    %59 = arith.addf %58, %2 : vector<64x64xf32>
    %cst_20 = arith.constant dense<0xFF800000> : vector<64xf32>
    %60 = vector.multi_reduction <maximumf>, %59, %cst_20 [1] : vector<64x64xf32> to vector<64xf32>
    %61 = vector.shape_cast %60 : vector<64xf32> to vector<64x1xf32>
    %62 = vector.broadcast %61 : vector<64x1xf32> to vector<64x64xf32>
    %63 = arith.subf %59, %62 : vector<64x64xf32>
    %64 = math.exp %63 : vector<64x64xf32>
    %cst_21 = arith.constant dense<0.000000e+00> : vector<64xf32>
    %65 = vector.multi_reduction <add>, %64, %cst_21 [1] : vector<64x64xf32> to vector<64xf32>
    %66 = vector.shape_cast %65 : vector<64xf32> to vector<64x1xf32>
    %cst_22 = arith.constant 9.99999968E-21 : f32
    %67 = vector.broadcast %cst_22 : f32 to vector<64x1xf32>
    %68 = arith.maximumf %66, %67 : vector<64x1xf32>
    %69 = tpu.reciprocal %68 {approx = true} : vector<64x1xf32> -> vector<64x1xf32>
    %70 = vector.broadcast %69 : vector<64x1xf32> to vector<64x64xf32>
    %71 = arith.mulf %64, %70 : vector<64x64xf32>
    %72 = arith.truncf %71 : vector<64x64xf32> to vector<64x64xbf16>
    %73 = vector.extract_strided_slice %19 {offsets = [0, 16], sizes = [64, 16], strides = [1, 1]} : vector<64x32xbf16> to vector<64x16xbf16>
    %cst_23 = arith.constant dense<0.000000e+00> : vector<64x16xf32>
    %74 = tpu.matmul %72, %73, %cst_23 {dimension_numbers = #tpu.dot_dimension_numbers<[1], [0], [0], [1], [0, 0, 1, 1], [], []>} : vector<64x64xbf16>, vector<64x16xbf16>, vector<64x16xf32> -> vector<64x16xf32>
    %cst_24 = arith.constant 0.000000e+00 : f32
    %75 = vector.broadcast %cst_24 : f32 to vector<64x16xf32>
    %76 = arith.maximumf %74, %75 : vector<64x16xf32>
    %77 = tpu.concatenate %48, %76 in 1 : vector<64x16xf32>, vector<64x16xf32> -> vector<64x32xf32>
    %78 = arith.truncf %77 : vector<64x32xf32> to vector<64x32xbf16>
    %c16 = arith.constant 16 : index
    %c0_25 = arith.constant 0 : index
    %79 = vector.load %arg3[%c16, %c0_25] : memref<176x34xbf16, #tpu.memory_space<vmem>>, vector<32x34xbf16>
    %c128 = arith.constant 128 : index
    %c0_26 = arith.constant 0 : index
    %80 = vector.load %arg3[%c128, %c0_26] : memref<176x34xbf16, #tpu.memory_space<vmem>>, vector<2x32xbf16>
    %cst_27 = arith.constant dense<0.000000e+00> : vector<64x34xf32>
    %81 = tpu.matmul %78, %79, %cst_27 {dimension_numbers = #tpu.dot_dimension_numbers<[1], [0], [0], [1], [0, 0, 1, 1], [], []>} : vector<64x32xbf16>, vector<32x34xbf16>, vector<64x34xf32> -> vector<64x34xf32>
    %82 = vector.extract_strided_slice %81 {offsets = [0, 0], sizes = [64, 32], strides = [1, 1]} : vector<64x34xf32> to vector<64x32xf32>
    %83 = vector.extract_strided_slice %81 {offsets = [0, 32], sizes = [64, 2], strides = [1, 1]} : vector<64x34xf32> to vector<64x2xf32>
    %84 = arith.truncf %82 : vector<64x32xf32> to vector<64x32xbf16>
    %cst_28 = arith.constant dense<0.000000e+00> : vector<2x64xf32>
    %85 = tpu.matmul %80, %84, %cst_28 {dimension_numbers = #tpu.dot_dimension_numbers<[1], [1], [0], [0], [0, 0, 1, 0], [], []>} : vector<2x32xbf16>, vector<64x32xbf16>, vector<2x64xf32> -> vector<2x64xf32>
    %86 = vector.extract_strided_slice %85 {offsets = [0, 0], sizes = [1, 64], strides = [1, 1]} : vector<2x64xf32> to vector<1x64xf32>
    %87 = vector.extract_strided_slice %83 {offsets = [0, 0], sizes = [64, 1], strides = [1, 1]} : vector<64x2xf32> to vector<64x1xf32>
    %88 = vector.broadcast %86 : vector<1x64xf32> to vector<64x64xf32>
    %89 = vector.broadcast %87 : vector<64x1xf32> to vector<64x64xf32>
    %90 = arith.addf %88, %89 : vector<64x64xf32>
    %cst_29 = arith.constant 0.000000e+00 : f32
    %91 = vector.broadcast %cst_29 : f32 to vector<64x64xf32>
    %92 = arith.cmpf ogt, %90, %91 : vector<64x64xf32>
    %cst_30 = arith.constant 2.000000e-01 : f32
    %93 = vector.broadcast %cst_30 : f32 to vector<64x64xf32>
    %94 = arith.mulf %93, %90 : vector<64x64xf32>
    %95 = arith.select %92, %90, %94 : vector<64x64xi1>, vector<64x64xf32>
    %96 = arith.addf %95, %2 : vector<64x64xf32>
    %cst_31 = arith.constant dense<0xFF800000> : vector<64xf32>
    %97 = vector.multi_reduction <maximumf>, %96, %cst_31 [1] : vector<64x64xf32> to vector<64xf32>
    %98 = vector.shape_cast %97 : vector<64xf32> to vector<64x1xf32>
    %99 = vector.broadcast %98 : vector<64x1xf32> to vector<64x64xf32>
    %100 = arith.subf %96, %99 : vector<64x64xf32>
    %101 = math.exp %100 : vector<64x64xf32>
    %cst_32 = arith.constant dense<0.000000e+00> : vector<64xf32>
    %102 = vector.multi_reduction <add>, %101, %cst_32 [1] : vector<64x64xf32> to vector<64xf32>
    %103 = vector.shape_cast %102 : vector<64xf32> to vector<64x1xf32>
    %cst_33 = arith.constant 9.99999968E-21 : f32
    %104 = vector.broadcast %cst_33 : f32 to vector<64x1xf32>
    %105 = arith.maximumf %103, %104 : vector<64x1xf32>
    %106 = tpu.reciprocal %105 {approx = true} : vector<64x1xf32> -> vector<64x1xf32>
    %107 = vector.broadcast %106 : vector<64x1xf32> to vector<64x64xf32>
    %108 = arith.mulf %101, %107 : vector<64x64xf32>
    %109 = arith.truncf %108 : vector<64x64xf32> to vector<64x64xbf16>
    %110 = vector.extract_strided_slice %84 {offsets = [0, 0], sizes = [64, 16], strides = [1, 1]} : vector<64x32xbf16> to vector<64x16xbf16>
    %cst_34 = arith.constant dense<0.000000e+00> : vector<64x16xf32>
    %111 = tpu.matmul %109, %110, %cst_34 {dimension_numbers = #tpu.dot_dimension_numbers<[1], [0], [0], [1], [0, 0, 1, 1], [], []>} : vector<64x64xbf16>, vector<64x16xbf16>, vector<64x16xf32> -> vector<64x16xf32>
    %cst_35 = arith.constant 0.000000e+00 : f32
    %112 = vector.broadcast %cst_35 : f32 to vector<64x16xf32>
    %113 = arith.maximumf %111, %112 : vector<64x16xf32>
    %114 = vector.extract_strided_slice %85 {offsets = [1, 0], sizes = [1, 64], strides = [1, 1]} : vector<2x64xf32> to vector<1x64xf32>
    %115 = vector.extract_strided_slice %83 {offsets = [0, 1], sizes = [64, 1], strides = [1, 1]} : vector<64x2xf32> to vector<64x1xf32>
    %116 = vector.broadcast %114 : vector<1x64xf32> to vector<64x64xf32>
    %117 = vector.broadcast %115 : vector<64x1xf32> to vector<64x64xf32>
    %118 = arith.addf %116, %117 : vector<64x64xf32>
    %cst_36 = arith.constant 0.000000e+00 : f32
    %119 = vector.broadcast %cst_36 : f32 to vector<64x64xf32>
    %120 = arith.cmpf ogt, %118, %119 : vector<64x64xf32>
    %cst_37 = arith.constant 2.000000e-01 : f32
    %121 = vector.broadcast %cst_37 : f32 to vector<64x64xf32>
    %122 = arith.mulf %121, %118 : vector<64x64xf32>
    %123 = arith.select %120, %118, %122 : vector<64x64xi1>, vector<64x64xf32>
    %124 = arith.addf %123, %2 : vector<64x64xf32>
    %cst_38 = arith.constant dense<0xFF800000> : vector<64xf32>
    %125 = vector.multi_reduction <maximumf>, %124, %cst_38 [1] : vector<64x64xf32> to vector<64xf32>
    %126 = vector.shape_cast %125 : vector<64xf32> to vector<64x1xf32>
    %127 = vector.broadcast %126 : vector<64x1xf32> to vector<64x64xf32>
    %128 = arith.subf %124, %127 : vector<64x64xf32>
    %129 = math.exp %128 : vector<64x64xf32>
    %cst_39 = arith.constant dense<0.000000e+00> : vector<64xf32>
    %130 = vector.multi_reduction <add>, %129, %cst_39 [1] : vector<64x64xf32> to vector<64xf32>
    %131 = vector.shape_cast %130 : vector<64xf32> to vector<64x1xf32>
    %cst_40 = arith.constant 9.99999968E-21 : f32
    %132 = vector.broadcast %cst_40 : f32 to vector<64x1xf32>
    %133 = arith.maximumf %131, %132 : vector<64x1xf32>
    %134 = tpu.reciprocal %133 {approx = true} : vector<64x1xf32> -> vector<64x1xf32>
    %135 = vector.broadcast %134 : vector<64x1xf32> to vector<64x64xf32>
    %136 = arith.mulf %129, %135 : vector<64x64xf32>
    %137 = arith.truncf %136 : vector<64x64xf32> to vector<64x64xbf16>
    %138 = vector.extract_strided_slice %84 {offsets = [0, 16], sizes = [64, 16], strides = [1, 1]} : vector<64x32xbf16> to vector<64x16xbf16>
    %cst_41 = arith.constant dense<0.000000e+00> : vector<64x16xf32>
    %139 = tpu.matmul %137, %138, %cst_41 {dimension_numbers = #tpu.dot_dimension_numbers<[1], [0], [0], [1], [0, 0, 1, 1], [], []>} : vector<64x64xbf16>, vector<64x16xbf16>, vector<64x16xf32> -> vector<64x16xf32>
    %cst_42 = arith.constant 0.000000e+00 : f32
    %140 = vector.broadcast %cst_42 : f32 to vector<64x16xf32>
    %141 = arith.maximumf %139, %140 : vector<64x16xf32>
    %142 = tpu.concatenate %113, %141 in 1 : vector<64x16xf32>, vector<64x16xf32> -> vector<64x32xf32>
    %143 = arith.truncf %142 : vector<64x32xf32> to vector<64x32xbf16>
    %c48 = arith.constant 48 : index
    %c0_43 = arith.constant 0 : index
    %144 = vector.load %arg3[%c48, %c0_43] : memref<176x34xbf16, #tpu.memory_space<vmem>>, vector<32x32xbf16>
    %cst_44 = arith.constant dense<0.000000e+00> : vector<64x32xf32>
    %145 = tpu.matmul %143, %144, %cst_44 {dimension_numbers = #tpu.dot_dimension_numbers<[1], [0], [0], [1], [0, 0, 1, 1], [], []>} : vector<64x32xbf16>, vector<32x32xbf16>, vector<64x32xf32> -> vector<64x32xf32>
    %cst_45 = arith.constant 1.000000e+00 : f32
    %146 = vector.broadcast %cst_45 : f32 to vector<64x1xf32>
    %147 = arith.subf %146, %1 : vector<64x1xf32>
    %148 = vector.broadcast %147 : vector<64x1xf32> to vector<64x32xf32>
    %149 = arith.mulf %145, %148 : vector<64x32xf32>
    %150 = arith.truncf %149 : vector<64x32xf32> to vector<64x32xbf16>
    %c80 = arith.constant 80 : index
    %c0_46 = arith.constant 0 : index
    %151 = vector.load %arg3[%c80, %c0_46] : memref<176x34xbf16, #tpu.memory_space<vmem>>, vector<32x17xbf16>
    %c144 = arith.constant 144 : index
    %c0_47 = arith.constant 0 : index
    %152 = vector.load %arg3[%c144, %c0_47] : memref<176x34xbf16, #tpu.memory_space<vmem>>, vector<1x16xbf16>
    %cst_48 = arith.constant dense<0.000000e+00> : vector<64x17xf32>
    %153 = tpu.matmul %150, %151, %cst_48 {dimension_numbers = #tpu.dot_dimension_numbers<[1], [0], [0], [1], [0, 0, 1, 1], [], []>} : vector<64x32xbf16>, vector<32x17xbf16>, vector<64x17xf32> -> vector<64x17xf32>
    %154 = vector.extract_strided_slice %153 {offsets = [0, 0], sizes = [64, 16], strides = [1, 1]} : vector<64x17xf32> to vector<64x16xf32>
    %155 = vector.extract_strided_slice %153 {offsets = [0, 16], sizes = [64, 1], strides = [1, 1]} : vector<64x17xf32> to vector<64x1xf32>
    %156 = arith.truncf %154 : vector<64x16xf32> to vector<64x16xbf16>
    %cst_49 = arith.constant dense<0.000000e+00> : vector<1x64xf32>
    %157 = tpu.matmul %152, %156, %cst_49 {dimension_numbers = #tpu.dot_dimension_numbers<[1], [1], [0], [0], [0, 0, 1, 0], [], []>} : vector<1x16xbf16>, vector<64x16xbf16>, vector<1x64xf32> -> vector<1x64xf32>
    %158 = vector.broadcast %157 : vector<1x64xf32> to vector<64x64xf32>
    %159 = vector.broadcast %155 : vector<64x1xf32> to vector<64x64xf32>
    %160 = arith.addf %158, %159 : vector<64x64xf32>
    %cst_50 = arith.constant 0.000000e+00 : f32
    %161 = vector.broadcast %cst_50 : f32 to vector<64x64xf32>
    %162 = arith.cmpf ogt, %160, %161 : vector<64x64xf32>
    %cst_51 = arith.constant 2.000000e-01 : f32
    %163 = vector.broadcast %cst_51 : f32 to vector<64x64xf32>
    %164 = arith.mulf %163, %160 : vector<64x64xf32>
    %165 = arith.select %162, %160, %164 : vector<64x64xi1>, vector<64x64xf32>
    %166 = arith.addf %165, %2 : vector<64x64xf32>
    %cst_52 = arith.constant dense<0xFF800000> : vector<64xf32>
    %167 = vector.multi_reduction <maximumf>, %166, %cst_52 [1] : vector<64x64xf32> to vector<64xf32>
    %168 = vector.shape_cast %167 : vector<64xf32> to vector<64x1xf32>
    %169 = vector.broadcast %168 : vector<64x1xf32> to vector<64x64xf32>
    %170 = arith.subf %166, %169 : vector<64x64xf32>
    %171 = math.exp %170 : vector<64x64xf32>
    %cst_53 = arith.constant dense<0.000000e+00> : vector<64xf32>
    %172 = vector.multi_reduction <add>, %171, %cst_53 [1] : vector<64x64xf32> to vector<64xf32>
    %173 = vector.shape_cast %172 : vector<64xf32> to vector<64x1xf32>
    %cst_54 = arith.constant 9.99999968E-21 : f32
    %174 = vector.broadcast %cst_54 : f32 to vector<64x1xf32>
    %175 = arith.maximumf %173, %174 : vector<64x1xf32>
    %176 = tpu.reciprocal %175 {approx = true} : vector<64x1xf32> -> vector<64x1xf32>
    %177 = vector.broadcast %176 : vector<64x1xf32> to vector<64x64xf32>
    %178 = arith.mulf %171, %177 : vector<64x64xf32>
    %179 = arith.truncf %178 : vector<64x64xf32> to vector<64x64xbf16>
    %cst_55 = arith.constant dense<0.000000e+00> : vector<64x16xf32>
    %180 = tpu.matmul %179, %156, %cst_55 {dimension_numbers = #tpu.dot_dimension_numbers<[1], [0], [0], [1], [0, 0, 1, 1], [], []>} : vector<64x64xbf16>, vector<64x16xbf16>, vector<64x16xf32> -> vector<64x16xf32>
    %181 = arith.mulf %180, %180 : vector<64x16xf32>
    %cst_56 = arith.constant dense<0.000000e+00> : vector<64xf32>
    %182 = vector.multi_reduction <add>, %181, %cst_56 [1] : vector<64x16xf32> to vector<64xf32>
    %183 = vector.shape_cast %182 : vector<64xf32> to vector<64x1xf32>
    %cst_57 = arith.constant 1.000000e-24 : f32
    %184 = vector.broadcast %cst_57 : f32 to vector<64x1xf32>
    %185 = arith.maximumf %183, %184 : vector<64x1xf32>
    %186 = math.rsqrt %185 : vector<64x1xf32>
    %187 = vector.broadcast %186 : vector<64x1xf32> to vector<64x16xf32>
    %188 = arith.mulf %180, %187 : vector<64x16xf32>
    %189 = arith.mulf %0, %0 : vector<64x16xf32>
    %cst_58 = arith.constant dense<0.000000e+00> : vector<64xf32>
    %190 = vector.multi_reduction <add>, %189, %cst_58 [1] : vector<64x16xf32> to vector<64xf32>
    %191 = vector.shape_cast %190 : vector<64xf32> to vector<64x1xf32>
    %cst_59 = arith.constant 1.000000e-24 : f32
    %192 = vector.broadcast %cst_59 : f32 to vector<64x1xf32>
    %193 = arith.maximumf %191, %192 : vector<64x1xf32>
    %194 = math.rsqrt %193 : vector<64x1xf32>
    %195 = vector.broadcast %194 : vector<64x1xf32> to vector<64x16xf32>
    %196 = arith.mulf %0, %195 : vector<64x16xf32>
    %197 = arith.mulf %188, %196 : vector<64x16xf32>
    %cst_60 = arith.constant dense<0.000000e+00> : vector<64xf32>
    %198 = vector.multi_reduction <add>, %197, %cst_60 [1] : vector<64x16xf32> to vector<64xf32>
    %199 = vector.shape_cast %198 : vector<64xf32> to vector<64x1xf32>
    %cst_61 = arith.constant 1.000000e+00 : f32
    %200 = vector.broadcast %cst_61 : f32 to vector<64x1xf32>
    %201 = arith.subf %200, %199 : vector<64x1xf32>
    %202 = arith.mulf %201, %201 : vector<64x1xf32>
    %203 = arith.mulf %202, %1 : vector<64x1xf32>
    %cst_62 = arith.constant dense<0.000000e+00> : vector<1xf32>
    %204 = vector.multi_reduction <add>, %203, %cst_62 [0] : vector<64x1xf32> to vector<1xf32>
    %205 = vector.shape_cast %204 : vector<1xf32> to vector<1x1xf32>
    %cst_63 = arith.constant 0.0526315793 : f32
    %206 = vector.broadcast %cst_63 : f32 to vector<1x1xf32>
    %207 = arith.mulf %205, %206 : vector<1x1xf32>
    %c0_64 = arith.constant 0 : index
    %c0_65 = arith.constant 0 : index
    %208 = vector.load %arg4[%c0_64, %c0_65] : memref<1x1xf32, #tpu.memory_space<vmem>>, vector<1x1xf32>
    tpu.vector_store %arg4[%c0_64, %c0_65], %207 {strides = array<i32>} : memref<1x1xf32, #tpu.memory_space<vmem>>, vector<1x1xf32>,
    return
  }
}

</mosaic_0001>

<bundles_post_ra>
// kernel: tpu_custom_call.1
= control target key start
LH: loop header
LB: loop body
LE: loop exit
PB: predicated region body
PF: predicated region fallthrough
CT: control target
= control target key end

     0   :  { %v2967_v2 = vmov 0   ;;  %s3996_s0 = inlined_call_operand.vmem [shape: f32[64,16], index: 0, kind: input, shape index: {}]   ;;  %s3997_s1 = inlined_call_operand.vmem [shape: f32[64,1], index: 1, kind: input, shape index: {}]   ;;  %s3998_s2 = inlined_call_operand.vmem [shape: f32[64,64], index: 2, kind: input, shape index: {}]   ;;  %s3999_s3 = inlined_call_operand.vmem [shape: bf16[176,34], index: 3, kind: input, shape index: {}]   ;;  %s4000_s4 = inlined_call_operand.hbm [shape: f32[1,1], index: 4, kind: output, shape index: {}]  }
   0x1   :  { %v27_v0 = vld [vmem:[%s3997_s1] sm:$0xff]  ;;  %v28_v1 = vld [vmem:[%s3997_s1 + $0x8] sm:$0xff]  ;;  %2668 = vset.pattern.permute.xlu1 %v2967_v2  ;;  %2667 = vset.pattern.permute.xlu0 %v2967_v2  ;;  %v30_v5 = vld [vmem:[%s3997_s1 + $0x18] sm:$0xff] }
   0x2   :  { %v45_v3 = vsub.f32 1.0, %v27_v0  ;;  %103 = vperm.xlu1 %2668, %v27_v0   ;;  %v46_v4 = vsub.f32 1.0, %v28_v1  ;;  %v29_v6 = vld [vmem:[%s3997_s1 + $0x10] sm:$0xff]  ;;  %v48_v7 = vsub.f32 1.0, %v30_v5 }
   0x3   :  { %v47_v8 = vsub.f32 1.0, %v29_v6 }
   0x4   :  { %55 = vperm.xlu0 %2667, %v45_v3  }
   0x6   :  { %108 = vperm.xlu1 %2668, %v28_v1  }
   0x8   :  { %60 = vperm.xlu0 %2667, %v46_v4  }
   0x9   :  { %9 = vsyncpa [#allocation3], 0  ;;  %v32_v9 = vld [vmem:[%s3997_s1 + $0x28] sm:$0xff]  ;;  %v31_v10 = vld [vmem:[%s3997_s1 + $0x20] sm:$0xff]  ;;  %v2968_v18 = vmov 32   ;;  %v141_v19 = vlaneseq  ;;  %vm174_vm0 = vcmask 130048  }
   0xa   :  { %70 = vperm.xlu1 %2668, %v48_v7   ;;  %v50_v11 = vsub.f32 1.0, %v32_v9  ;;  %v49_v12 = vsub.f32 1.0, %v31_v10  ;;  %v2719_v13 = vld [vmem:[%s3999_s3] sm:$0xff]   ;;  %v34_v14 = vld [vmem:[%s3997_s1 + $0x38] sm:$0xff]  ;;  %v33_v15 = vld [vmem:[%s3997_s1 + $0x30] sm:$0xff]  ;;  %vm2970_vm1 = vmmov 0  }
   0xb   :  { %2496 = vmatprep.subr.bf16.mxu0 %v2719_v13  ;;  %v52_v16 = vsub.f32 1.0, %v34_v14  ;;  %v51_v17 = vsub.f32 1.0, %v33_v15  ;;  %v3030_v20 = vshrl.u32 %v141_v19, 7  ;;  %v43_v21 = vld [vmem:[%s3999_s3 + $0x50] sm:$0x1]  ;;  %v19_v27 = vld [vmem:[%s3996_s0] sm:$0xff] }
   0xc   :  { %65 = vperm.xlu0 %2667, %v47_v8   ;;  %2497 = vmatpush3.bf16.msra.mxu0 %v2719_v13  ;;  %v44_v22 = vunpack.c.l.bf16 %v43_v21  ;;  %v20_v28 = vld [vmem:[%s3996_s0 + $0x8] sm:$0xff]  ;;  %v22_v39 = vld [vmem:[%s3996_s0 + $0x18] sm:$0xff]  ;;  %v21_v41 = vld [vmem:[%s3996_s0 + $0x10] sm:$0xff]  ;;  %v2969_v13 = vmov 0.0   ;;  %vm256_vm2 = vcmask 261120   ;;  %vm396_vm3 = vcmask 523264  }
   0xd   :  { %v3036_v23 = vsub.s32 0, %v3030_v20  ;;  %v24_v53 = vld [vmem:[%s3996_s0 + $0x28] sm:$0xff]  ;;  %v23_v54 = vld [vmem:[%s3996_s0 + $0x20] sm:$0xff]  ;;  %v26_v2 = vld [vmem:[%s3996_s0 + $0x38] sm:$0xff]  ;;  %2506 = vmatprep.subr.bf16.mxu1 %v2969_v13  ;;  %2514 = vmatprep.mubr.msk.bf16.mxu1 %vm2970_vm1, %v2969_v13  ;;  %s2972_s17 = smov 112   ;;  %s2973_s22 = smov 16  }
   0xe   :  { %118 = vperm.xlu1 %2668, %v30_v5   ;;  %v25_v3 = vld [vmem:[%s3996_s0 + $0x30] sm:$0xff]  ;;  %s2975_s28 = smov [#allocation2]  }
   0xf   :  { %v144_v24 = vrot.slane %v44_v22, %v3036_v23  ;;  %s2364_s29 = sshll.u32 %s2975_s28, 4  ;;  %s2365_s29 = int_to_ptr.vmem [resolvable:$true] %s2364_s29 }
  0x10   :  { %113 = vperm.xlu0 %2667, %v29_v6   ;;  %s2943_s30 = scalar_lea.vmem %s2365_s29, 16  ;;  %p2948_p1 = scmp.lt.s32.totalorder %s2365_s29, %s2365_s29 }
  0x11   :  { %p2944_p0 = scmp.ne.s32.totalorder %s2365_s29, %s2943_s30 }
  0x12   :  { %80 = vperm.xlu1 %2668, %v50_v11  }
  0x14   :  { %75 = vperm.xlu0 %2667, %v49_v12  }
  0x16   :  { %128 = vperm.xlu1 %2668, %v32_v9  }
  0x18   :  { %123 = vperm.xlu0 %2667, %v31_v10  }
  0x1a   :  { %90 = vperm.xlu1 %2668, %v52_v16  }
  0x1c   :  { %85 = vperm.xlu0 %2667, %v51_v17  }
  0x1e   :  { %138 = vperm.xlu1 %2668, %v34_v14  }
  0x20   :  { %133 = vperm.xlu0 %2667, %v33_v15  }
  0x22   :  { %2669 = vset.pattern.permute.xlu1 %v2968_v18 }
  0x24   :  { %2670 = vset.pattern.permute.xlu0 %v2968_v18 }
  0x81   :  { %v104_v25 = vpop.permute.xlu1 %103 }
  0x82   :  { %v145_v29 = vmul.f32 %v144_v24, %v104_v25 }
  0x83   :  { %v3039_v26 = vpop.permute.xlu0 %55 }
  0x84   :  { %v93_v30 = vmul.f32 %v3039_v26, %v19_v27 }
  0x85   :  { %v109_v31 = vpop.permute.xlu1 %108 }
  0x86   :  { %v146_v32 = vmul.f32 %v144_v24, %v109_v31  ;;  %v153_v36 = vadd.f32 %v145_v29, %v93_v30 }
  0x87   :  { %v3048_v33 = vpop.permute.xlu0 %60 }
  0x88   :  { %v94_v34 = vmul.f32 %v3048_v33, %v20_v28 }
  0x89   :  { %v3051_v35 = vpop.permute.xlu1 %70 }
  0x8a   :  { %v154_v37 = vadd.f32 %v146_v32, %v94_v34  ;;  %v96_v43 = vmul.f32 %v3051_v35, %v22_v39  ;;  %v2971_v34 = vmov 33  }
  0x8b   :  { %v3053_v38 = vpop.permute.xlu0 %65 }
  0x8c   :  { %v161_v40 = vpack.c.bf16 %v154_v37, %v153_v36  ;;  %v95_v46 = vmul.f32 %v3053_v38, %v21_v41  ;;  %v167_v37 = vld [vmem:[%s3999_s3 + $0x38] sm:$0x1] }
  0x8d   :  { %v119_v42 = vpop.permute.xlu1 %118 }
  0x8e   :  { %2498 = vmatprep.mubr.msk.bf16.mxu0 %vm174_vm0, %v161_v40  ;;  %v148_v44 = vmul.f32 %v144_v24, %v119_v42 }
  0x8f   :  { %v114_v45 = vpop.permute.xlu0 %113 }
  0x90   :  { %v147_v47 = vmul.f32 %v144_v24, %v114_v45  ;;  %v156_v48 = vadd.f32 %v148_v44, %v96_v43 }
  0x91   :  { %v3064_v50 = vpop.permute.xlu1 %80 }
  0x92   :  { %v155_v49 = vadd.f32 %v147_v47, %v95_v46  ;;  %v98_v56 = vmul.f32 %v3064_v50, %v24_v53  ;;  %v584_v46 = vsub.s32 1, %v3030_v20 }
  0x93   :  { %v3066_v51 = vpop.permute.xlu0 %75 }
  0x94   :  { %v162_v52 = vpack.c.bf16 %v156_v48, %v155_v49  ;;  %v97_v59 = vmul.f32 %v3066_v51, %v23_v54 }
  0x95   :  { %v129_v55 = vpop.permute.xlu1 %128 }
  0x96   :  { %2499 = vmatmul.mubr.msk.bf16.vlgmr.msra.gmra.mrb[0].mxu0 %vm174_vm0, %v162_v52  ;;  %v150_v57 = vmul.f32 %v144_v24, %v129_v55 }
  0x97   :  { %v124_v58 = vpop.permute.xlu0 %123 }
  0x98   :  { %v149_v60 = vmul.f32 %v144_v24, %v124_v58  ;;  %v158_v61 = vadd.f32 %v150_v57, %v98_v56  ;;  %v3138_v56 = vld [vmem:[%s3998_s2 + $0x8] sm:$0xff] }
  0x99   :  { %v3077_v63 = vpop.permute.xlu1 %90 }
  0x9a   :  { %v157_v62 = vadd.f32 %v149_v60, %v97_v59  ;;  %v100_v5 = vmul.f32 %v3077_v63, %v26_v2 }
  0x9b   :  { %v3079_v0 = vpop.permute.xlu0 %85 }
  0x9c   :  { %v163_v1 = vpack.c.bf16 %v158_v61, %v157_v62  ;;  %v99_v8 = vmul.f32 %v3079_v0, %v25_v3  ;;  %v35_v61 = vld [vmem:[%s3998_s2] sm:$0xff] }
  0x9d   :  { %v139_v4 = vpop.permute.xlu1 %138  ;;  %v3146_v62 = vld [vmem:[%s3998_s2 + $0x20] sm:$0xff] }
  0x9e   :  { %2502 = vmatprep.mubr.msk.bf16.mxu0 %vm174_vm0, %v163_v1  ;;  %v152_v6 = vmul.f32 %v144_v24, %v139_v4  ;;  %v3151_v1 = vld [vmem:[%s3998_s2 + $0x10] sm:$0xff] }
  0x9f   :  { %v134_v7 = vpop.permute.xlu0 %133 }
  0xa0   :  { %v151_v9 = vmul.f32 %v144_v24, %v134_v7  ;;  %v160_v10 = vadd.f32 %v152_v6, %v100_v5 }
  0xa2   :  { %v159_v11 = vadd.f32 %v151_v9, %v99_v8 }
  0xa4   :  { %v164_v12 = vpack.c.bf16 %v160_v10, %v159_v11 }
  0xa6   :  { %2503 = vmatmul.mubr.msk.bf16.gmra.mrb[4].mxu0 %vm174_vm0, %v164_v12 }
 0x169   :  { %v2500_v14 = vpop.f32.mrb[0].mxu0 }
 0x16a   :  { %328 = vperm.xlu1 %2669, %v2500_v14   ;;  %v221_v15 = vpop.f32.mrb[1].mxu0 }
 0x16b   :  { %318 = vperm.xlu0 %2670, %v221_v15   ;;  %v2501_v16 = vpop.f32.mrb[2].mxu0 }
 0x16c   :  { %v3094_v17 = vpack.c.bf16 %v2501_v16, %v2500_v14  ;;  %v224_v19 = vpop.f32.mrb[3].mxu0 }
 0x16d   :  { %v3096_v21 = vpack.c.bf16 %v224_v19, %v221_v15 }
 0x16e   :  { %323 = vperm.xlu1 %2669, %v224_v19   ;;  %v264_v24 = vsel %vm256_vm2, %v3094_v17, 0 }
 0x16f   :  { %333 = vperm.xlu0 %2670, %v2501_v16   ;;  %2518 = vmatprep.subr.bf16.mxu0 %v3096_v21  ;;  %v261_v22 = vsel %vm256_vm2, %v3096_v21, 0 }
 0x170   :  { %2507 = vmatpush3.bf16.xpose.msra.mxu1 %v261_v22  ;;  %2519 = vmatpush3.bf16.msra.mxu0 %v3096_v21 }
 0x171   :  { %2520 = vmatprep.subr.bf16.mxu0 %v3094_v17  ;;  %2508 = vmatprep.subr.bf16.mxu1 %v2969_v13 }
 0x174   :  { %2521 = vmatpush3.bf16.msra.mxu0 %v3094_v17 }
 0x178   :  { %2509 = vmatpush3.bf16.xpose.msra.mxu1 %v264_v24 }
 0x179   :  { %v2504_v25 = vpop.f32.mrb[4].mxu0  ;;  %2510 = vmatprep.subr.bf16.mxu1 %v2969_v13 }
 0x17a   :  { %348 = vperm.xlu1 %2669, %v2504_v25   ;;  %v237_v27 = vpop.f32.mrb[5].mxu0 }
 0x17b   :  { %v2505_v28 = vpop.f32.mrb[6].mxu0 }
 0x17c   :  { %v3108_v29 = vpack.c.bf16 %v2505_v28, %v2504_v25  ;;  %353 = vperm.xlu0 %2670, %v2505_v28   ;;  %v240_v30 = vpop.f32.mrb[7].mxu0 }
 0x17d   :  { %v3110_v31 = vpack.c.bf16 %v240_v30, %v237_v27 }
 0x17e   :  { %338 = vperm.xlu1 %2669, %v237_v27   ;;  %v270_v36 = vsel %vm256_vm2, %v3108_v29, 0 }
 0x17f   :  { %2522 = vmatprep.subr.bf16.mxu0 %v3110_v31  ;;  %v267_v32 = vsel %vm256_vm2, %v3110_v31, 0 }
 0x180   :  { %343 = vperm.xlu0 %2670, %v240_v30   ;;  %2511 = vmatpush3.bf16.xpose.msra.mxu1 %v267_v32  ;;  %v3172_v32 = vld [vmem:[%s3998_s2 + $0x30] sm:$0xff] }
 0x181   :  { %2523 = vmatpush3.bf16.msra.mxu0 %v3110_v31  ;;  %2512 = vmatprep.subr.bf16.mxu1 %v2969_v13 }
 0x182   :  { %2524 = vmatprep.subr.bf16.mxu0 %v3108_v29  ;;  %2671 = vset.pattern.permute.xlu1 %v2971_v34 }
 0x183   :  { %587 = vperm.xlu1 %2671, %v221_v15  }
 0x184   :  { %2672 = vset.pattern.permute.xlu0 %v2971_v34 }
 0x185   :  { %2525 = vmatpush3.bf16.msra.mxu0 %v3108_v29  ;;  %591 = vperm.xlu0 %2672, %v224_v19  }
 0x187   :  { %595 = vperm.xlu1 %2671, %v2500_v14  }
 0x188   :  { %2513 = vmatpush3.bf16.xpose.msra.mxu1 %v270_v36 }
 0x189   :  { %603 = vperm.xlu0 %2672, %v237_v27  }
 0x18b   :  { %599 = vperm.xlu1 %2671, %v2501_v16  }
 0x18d   :  { %611 = vperm.xlu0 %2672, %v2504_v25  }
 0x18f   :  { %607 = vperm.xlu1 %2671, %v240_v30   ;;  %2515 = vmatmul.mubr.msk.bf16.vlgmr.msra.gmra.mrb[0].mxu1 %vm256_vm2, %v167_v37  ;;  %v3177_v37 = vld [vmem:[%s3998_s2 + $0x18] sm:$0xff] }
 0x191   :  { %2694 = vset.pattern.permute.xlu0 %v2968_v18 }
 0x193   :  { %615 = vperm.xlu1 %2671, %v2505_v28  }
 0x197   :  { %2693 = vset.pattern.permute.xlu1 %v2968_v18 }
 0x1e9   :  { %v329_v39 = vpop.permute.xlu1 %328 }
 0x1ea   :  { %v319_v40 = vpop.permute.xlu0 %318 }
 0x1ed   :  { %v324_v41 = vpop.permute.xlu1 %323 }
 0x1ee   :  { %v334_v42 = vpop.permute.xlu0 %333 }
 0x1f9   :  { %v349_v43 = vpop.permute.xlu1 %348 }
 0x1fb   :  { %v354_v44 = vpop.permute.xlu0 %353 }
 0x1fd   :  { %v339_v45 = vpop.permute.xlu1 %338 }
 0x1ff   :  { %v344_v47 = vpop.permute.xlu0 %343 }
 0x202   :  { %v588_v54 = vpop.permute.xlu1 %587 }
 0x204   :  { %v592_v8 = vpop.permute.xlu0 %591 }
 0x206   :  { %v596_v15 = vpop.permute.xlu1 %595 }
 0x262   :  { %v306_v48 = vpop.f32.mrb[0].mxu1 }
 0x263   :  { %v315_v49 = vrot.slane %v306_v48, %v3036_v23  ;;  %v3133_v52 = vrot.slane %v306_v48, %v584_v46  ;;  %v2516_v53 = vpop.f32.mrb[1].mxu1 }
 0x264   :  { %v309_v18 = vpop.f32.mrb[2].mxu1 }
 0x265   :  { %v2517_v55 = vpop.f32.mrb[3].mxu1  ;;  %v357_v57 = vadd.f32 %v324_v41, %v315_v49  ;;  %v356_v58 = vadd.f32 %v319_v40, %v315_v49  ;;  %v360_v59 = vadd.f32 %v339_v45, %v315_v49  ;;  %v358_v60 = vadd.f32 %v329_v39, %v315_v49  ;;  %v604_v41 = vpop.permute.xlu0 %603 }
 0x266   :  { %v362_v2 = vadd.f32 %v349_v43, %v315_v49  ;;  %v359_v3 = vadd.f32 %v334_v42, %v315_v49  ;;  %v618_v4 = vadd.f32 %v588_v54, %v3133_v52  ;;  %v361_v5 = vadd.f32 %v344_v47, %v315_v49  ;;  %v600_v54 = vpop.permute.xlu1 %599 }
 0x267   :  { %vm365_vm4 = vcmp.gt.f32.partialorder %v357_v57, 0.0  ;;  %v373_v6 = vmul.f32 0.2, %v357_v57  ;;  %vm364_vm5 = vcmp.gt.f32.partialorder %v356_v58, 0.0  ;;  %v372_v7 = vmul.f32 0.2, %v356_v58 }
 0x268   :  { %vm368_vm6 = vcmp.gt.f32.partialorder %v360_v59, 0.0  ;;  %v376_v9 = vmul.f32 0.2, %v360_v59  ;;  %vm366_vm7 = vcmp.gt.f32.partialorder %v358_v60, 0.0  ;;  %v374_v10 = vmul.f32 0.2, %v358_v60 }
 0x269   :  { %v381_v11 = vsel %vm365_vm4, %v357_v57, %v373_v6  ;;  %v380_v12 = vsel %vm364_vm5, %v356_v58, %v372_v7  ;;  %vm370_vm8 = vcmp.gt.f32.partialorder %v362_v2, 0.0  ;;  %v378_v14 = vmul.f32 0.2, %v362_v2  ;;  %v612_v7 = vpop.permute.xlu0 %611 }
 0x26a   :  { %v3155_v16 = vadd.f32 %v381_v11, %v3138_v56  ;;  %v3157_v19 = vadd.f32 %v380_v12, %v35_v61  ;;  %v384_v22 = vsel %vm368_vm6, %v360_v59, %v376_v9  ;;  %v382_v24 = vsel %vm366_vm7, %v358_v60, %v374_v10  ;;  %v3194_v59 = vld [vmem:[%s3998_s2 + $0x28] sm:$0xff] }
 0x26b   :  { %v3160_v25 = vadd.f32 %v384_v22, %v3146_v62  ;;  %v3163_v27 = vadd.f32 %v382_v24, %v3151_v1  ;;  %vm367_vm9 = vcmp.gt.f32.partialorder %v359_v3, 0.0  ;;  %v386_v36 = vsel %vm370_vm8, %v362_v2, %v378_v14 }
 0x26c   :  { %v400_v28 = vsel %vm396_vm3, %v3155_v16, -inf  ;;  %v397_v30 = vsel %vm396_vm3, %v3157_v19, -inf  ;;  %v375_v39 = vmul.f32 0.2, %v359_v3  ;;  %vm626_vm10 = vcmp.gt.f32.partialorder %v618_v4, 0.0 }
 0x26d   :  { %401 = vmax.xlane.f32.xlu1 %v400_v28  ;;  %398 = vmax.xlane.f32.xlu0 %v397_v30  ;;  %v634_v40 = vmul.f32 0.2, %v618_v4  ;;  %vm369_vm11 = vcmp.gt.f32.partialorder %v361_v5, 0.0  ;;  %v377_v43 = vmul.f32 0.2, %v361_v5  ;;  %v3180_v45 = vadd.f32 %v386_v36, %v3172_v32 }
 0x26e   :  { %v383_v42 = vsel %vm367_vm9, %v359_v3, %v375_v39  ;;  %v620_v48 = vadd.f32 %v596_v15, %v3133_v52  ;;  %v363_v53 = vadd.f32 %v354_v44, %v315_v49  ;;  %v409_v18 = vsel %vm396_vm3, %v3160_v25, -inf  ;;  %v608_v15 = vpop.permute.xlu1 %607 }
 0x26f   :  { %v3183_v47 = vadd.f32 %v383_v42, %v3177_v37  ;;  %v403_v55 = vsel %vm396_vm3, %v3163_v27, -inf  ;;  %v642_v57 = vsel %vm626_vm10, %v618_v4, %v634_v40  ;;  %v622_v58 = vadd.f32 %v604_v41, %v3133_v52 }
 0x270   :  { %v385_v60 = vsel %vm369_vm11, %v361_v5, %v377_v43  ;;  %vm628_vm12 = vcmp.gt.f32.partialorder %v620_v48, 0.0  ;;  %v636_v44 = vmul.f32 0.2, %v620_v48  ;;  %v619_v49 = vadd.f32 %v592_v8, %v3133_v52  ;;  %v3209_v8 = vld [vmem:[%s3998_s2 + $0x38] sm:$0xff] }
 0x271   :  { %410 = vmax.xlane.f32.xlu1 %v409_v18  ;;  %404 = vmax.xlane.f32.xlu0 %v403_v55  ;;  %vm371_vm13 = vcmp.gt.f32.partialorder %v363_v53, 0.0  ;;  %v379_v2 = vmul.f32 0.2, %v363_v53  ;;  %v415_v3 = vsel %vm396_vm3, %v3180_v45, -inf  ;;  %v406_v4 = vsel %vm396_vm3, %v3183_v47, -inf }
 0x272   :  { %v3201_v6 = vadd.f32 %v642_v57, %v35_v61  ;;  %v3204_v9 = vadd.f32 %v385_v60, %v3194_v59  ;;  %v644_v10 = vsel %vm628_vm12, %v620_v48, %v636_v44  ;;  %vm630_vm14 = vcmp.gt.f32.partialorder %v622_v58, 0.0  ;;  %v616_v43 = vpop.permute.xlu1 %615 }
 0x273   :  { %v638_v5 = vmul.f32 0.2, %v622_v58  ;;  %v387_v11 = vsel %vm371_vm13, %v363_v53, %v379_v2  ;;  %v635_v12 = vmul.f32 0.2, %v619_v49  ;;  %v624_v14 = vadd.f32 %v612_v7, %v3133_v52 }
 0x274   :  { %v621_v61 = vadd.f32 %v600_v54, %v3133_v52  ;;  %vm627_vm15 = vcmp.gt.f32.partialorder %v619_v49, 0.0  ;;  %v658_v22 = vsel %vm396_vm3, %v3201_v6, -inf  ;;  %v412_v24 = vsel %vm396_vm3, %v3204_v9, -inf }
 0x275   :  { %416 = vmax.xlane.f32.xlu1 %v415_v3  ;;  %407 = vmax.xlane.f32.xlu0 %v406_v4  ;;  %v3218_v28 = vadd.f32 %v644_v10, %v3151_v1  ;;  %v3221_v30 = vadd.f32 %v387_v11, %v3209_v8  ;;  %v646_v36 = vsel %vm630_vm14, %v622_v58, %v638_v5  ;;  %v640_v40 = vmul.f32 0.2, %v624_v14 }
 0x276   :  { %v643_v39 = vsel %vm627_vm15, %v619_v49, %v635_v12  ;;  %v637_v41 = vmul.f32 0.2, %v621_v61  ;;  %v623_v42 = vadd.f32 %v608_v15, %v3133_v52  ;;  %vm632_vm4 = vcmp.gt.f32.partialorder %v624_v14, 0.0 }
 0x277   :  { %vm629_vm5 = vcmp.gt.f32.partialorder %v621_v61, 0.0  ;;  %v664_v48 = vsel %vm396_vm3, %v3218_v28, -inf  ;;  %v418_v1 = vsel %vm396_vm3, %v3221_v30, -inf  ;;  %v3229_v53 = vadd.f32 %v646_v36, %v3146_v62 }
 0x278   :  { %v3232_v54 = vadd.f32 %v643_v39, %v3138_v56  ;;  %v648_v18 = vsel %vm632_vm4, %v624_v14, %v640_v40  ;;  %v645_v55 = vsel %vm629_vm5, %v621_v61, %v637_v41  ;;  %v639_v57 = vmul.f32 0.2, %v623_v42 }
 0x279   :  { %659 = vmax.xlane.f32.xlu1 %v658_v22  ;;  %413 = vmax.xlane.f32.xlu0 %v412_v24  ;;  %v625_v58 = vadd.f32 %v616_v43, %v3133_v52  ;;  %vm631_vm6 = vcmp.gt.f32.partialorder %v623_v42, 0.0  ;;  %v670_v60 = vsel %vm396_vm3, %v3229_v53, -inf  ;;  %v3240_v62 = vadd.f32 %v648_v18, %v3172_v32 }
 0x27a   :  { %v661_v44 = vsel %vm396_vm3, %v3232_v54, -inf  ;;  %v3243_v56 = vadd.f32 %v645_v55, %v3177_v37  ;;  %v647_v49 = vsel %vm631_vm6, %v623_v42, %v639_v57 }
 0x27b   :  { %v641_v2 = vmul.f32 0.2, %v625_v58  ;;  %vm633_vm7 = vcmp.gt.f32.partialorder %v625_v58, 0.0  ;;  %v676_v52 = vsel %vm396_vm3, %v3240_v62, -inf  ;;  %v3250_v4 = vadd.f32 %v647_v49, %v3194_v59 }
 0x27c   :  { %v667_v3 = vsel %vm396_vm3, %v3243_v56, -inf }
 0x27d   :  { %665 = vmax.xlane.f32.xlu1 %v664_v48  ;;  %419 = vmax.xlane.f32.xlu0 %v418_v1  ;;  %v649_v7 = vsel %vm633_vm7, %v625_v58, %v641_v2  ;;  %v673_v10 = vsel %vm396_vm3, %v3250_v4, -inf }
 0x27e   :  { %v3255_v5 = vadd.f32 %v649_v7, %v3209_v8 }
 0x280   :  { %v679_v11 = vsel %vm396_vm3, %v3255_v5, -inf }
 0x281   :  { %671 = vmax.xlane.f32.xlu1 %v670_v60  ;;  %662 = vmax.xlane.f32.xlu0 %v661_v44 }
 0x285   :  { %677 = vmax.xlane.f32.xlu1 %v676_v52  ;;  %668 = vmax.xlane.f32.xlu0 %v667_v3 }
 0x289   :  { %674 = vmax.xlane.f32.xlu0 %v673_v10 }
 0x28d   :  { %680 = vmax.xlane.f32.xlu0 %v679_v11 }
 0x296   :  { %762 = vrot.lane.b32.xlu1 %v3096_v21, %s2972_s17 }
 0x2fa   :  { %v402_v12 = vpop.xlane.xlu1 %401  ;;  %v399_v14 = vpop.xlane.xlu0 %398 }
 0x2fb   :  { %v422_v61 = vsub.f32 %v3155_v16, %v402_v12  ;;  %v421_v15 = vsub.f32 %v3157_v19, %v399_v14 }
 0x2fd   :  { %v431_v22 = vmul.f32 1.442695, %v422_v61  ;;  %v429_v24 = vmul.f32 1.442695, %v421_v15 }
 0x2fe   :  { %v411_v36 = vpop.xlane.xlu1 %410  ;;  %v405_v39 = vpop.xlane.xlu0 %404 }
 0x2ff   :  { %2726 = vpow2.f32 %v431_v22  ;;  %v425_v40 = vsub.f32 %v3160_v25, %v411_v36  ;;  %v423_v41 = vsub.f32 %v3163_v27, %v405_v39 }
 0x300   :  { %2728 = vpow2.f32 %v429_v24 }
 0x301   :  { %v433_v42 = vmul.f32 1.442695, %v423_v41  ;;  %v437_v43 = vmul.f32 1.442695, %v425_v40 }
 0x302   :  { %v417_v48 = vpop.xlane.xlu1 %416  ;;  %v408_v21 = vpop.xlane.xlu0 %407 }
 0x303   :  { %v427_v1 = vsub.f32 %v3180_v45, %v417_v48  ;;  %v424_v16 = vsub.f32 %v3183_v47, %v408_v21  ;;  %2730 = vpow2.f32 %v433_v42 }
 0x304   :  { %2732 = vpow2.f32 %v437_v43 }
 0x305   :  { %v435_v19 = vmul.f32 1.442695, %v424_v16  ;;  %v441_v18 = vmul.f32 1.442695, %v427_v1 }
 0x306   :  { %v660_v55 = vpop.xlane.xlu1 %659  ;;  %v414_v57 = vpop.xlane.xlu0 %413 }
 0x307   :  { %v682_v58 = vsub.f32 %v3201_v6, %v660_v55  ;;  %v426_v25 = vsub.f32 %v3204_v9, %v414_v57  ;;  %2734 = vpow2.f32 %v435_v19 }
 0x308   :  { %2736 = vpow2.f32 %v441_v18 }
 0x309   :  { %v3269_v27 = vpop.eup %2726  ;;  %v439_v60 = vmul.f32 1.442695, %v426_v25  ;;  %v690_v45 = vmul.f32 1.442695, %v682_v58 }
 0x30a   :  { %v3271_v44 = vpop.eup %2728  ;;  %v666_v49 = vpop.xlane.xlu1 %665  ;;  %v448_v2 = vsel %vm396_vm3, %v3269_v27, 0.0 }
 0x30b   :  { %v420_v47 = vpop.xlane.xlu0 %419  ;;  %v684_v52 = vsub.f32 %v3218_v28, %v666_v49  ;;  %449 = vadd.xlane.f32.xlu0 %v448_v2  ;;  %v445_v6 = vsel %vm396_vm3, %v3271_v44, 0.0  ;;  %2738 = vpow2.f32 %v439_v60 }
 0x30c   :  { %v428_v3 = vsub.f32 %v3221_v30, %v420_v47  ;;  %446 = vadd.xlane.f32.xlu1 %v445_v6  ;;  %2740 = vpow2.f32 %v690_v45 }
 0x30d   :  { %v3279_v7 = vpop.eup %2730  ;;  %v694_v10 = vmul.f32 1.442695, %v684_v52 }
 0x30e   :  { %v443_v9 = vmul.f32 1.442695, %v428_v3  ;;  %v672_v11 = vpop.xlane.xlu1 %671  ;;  %v451_v28 = vsel %vm396_vm3, %v3279_v7, 0.0  ;;  %v3285_v30 = vpop.eup %2732 }
 0x30f   :  { %v663_v12 = vpop.xlane.xlu0 %662  ;;  %v686_v14 = vsub.f32 %v3229_v53, %v672_v11  ;;  %v457_v53 = vsel %vm396_vm3, %v3285_v30, 0.0 }
 0x310   :  { %v683_v61 = vsub.f32 %v3232_v54, %v663_v12  ;;  %2742 = vpow2.f32 %v443_v9  ;;  %452 = vadd.xlane.f32.xlu1 %v451_v28 }
 0x311   :  { %v3287_v22 = vpop.eup %2734  ;;  %2744 = vpow2.f32 %v694_v10  ;;  %v698_v24 = vmul.f32 1.442695, %v686_v14 }
 0x312   :  { %v692_v15 = vmul.f32 1.442695, %v683_v61  ;;  %v678_v36 = vpop.xlane.xlu1 %677  ;;  %v454_v54 = vsel %vm396_vm3, %v3287_v22, 0.0  ;;  %v3294_v41 = vpop.eup %2736 }
 0x313   :  { %v669_v39 = vpop.xlane.xlu0 %668  ;;  %455 = vadd.xlane.f32.xlu0 %v454_v54  ;;  %v688_v48 = vsub.f32 %v3240_v62, %v678_v36  ;;  %v463_v16 = vsel %vm396_vm3, %v3294_v41, 0.0 }
 0x314   :  { %v685_v40 = vsub.f32 %v3243_v56, %v669_v39  ;;  %2746 = vpow2.f32 %v692_v15  ;;  %458 = vadd.xlane.f32.xlu1 %v457_v53 }
 0x315   :  { %v3296_v43 = vpop.eup %2738  ;;  %2748 = vpow2.f32 %v698_v24  ;;  %v702_v57 = vmul.f32 1.442695, %v688_v48 }
 0x316   :  { %v696_v42 = vmul.f32 1.442695, %v685_v40  ;;  %v3299_v21 = vpop.permute.xlu1 %762  ;;  %v460_v19 = vsel %vm396_vm3, %v3296_v43, 0.0  ;;  %v3307_v18 = vpop.eup %2740 }
 0x317   :  { %v675_v56 = vpop.xlane.xlu0 %674  ;;  %2534 = vmatprep.subr.bf16.mxu0 %v3299_v21  ;;  %461 = vadd.xlane.f32.xlu0 %v460_v19  ;;  %v706_v25 = vsel %vm396_vm3, %v3307_v18, 0.0 }
 0x318   :  { %v687_v1 = vsub.f32 %v3250_v4, %v675_v56  ;;  %2750 = vpow2.f32 %v696_v42  ;;  %464 = vadd.xlane.f32.xlu1 %v463_v16 }
 0x31a   :  { %v700_v55 = vmul.f32 1.442695, %v687_v1  ;;  %v3309_v62 = vpop.eup %2742 }
 0x31b   :  { %v681_v58 = vpop.xlane.xlu0 %680  ;;  %v466_v60 = vsel %vm396_vm3, %v3309_v62, 0.0  ;;  %v3316_v45 = vpop.eup %2744 }
 0x31c   :  { %2752 = vpow2.f32 %v700_v55  ;;  %v689_v4 = vsub.f32 %v3255_v5, %v681_v58  ;;  %707 = vadd.xlane.f32.xlu1 %v706_v25  ;;  %467 = vadd.xlane.f32.xlu0 %v466_v60  ;;  %v712_v2 = vsel %vm396_vm3, %v3316_v45, 0.0 }
 0x31d   :  { %2754 = vpow2.f32 %v702_v57 }
 0x31e   :  { %v3318_v49 = vpop.eup %2746  ;;  %v704_v47 = vmul.f32 1.442695, %v689_v4 }
 0x31f   :  { %v709_v5 = vsel %vm396_vm3, %v3318_v49, 0.0  ;;  %v3324_v52 = vpop.eup %2748 }
 0x320   :  { %713 = vadd.xlane.f32.xlu1 %v712_v2  ;;  %710 = vadd.xlane.f32.xlu0 %v709_v5  ;;  %2756 = vpow2.f32 %v704_v47  ;;  %v718_v6 = vsel %vm396_vm3, %v3324_v52, 0.0 }
 0x322   :  { %v3326_v3 = vpop.eup %2750 }
 0x323   :  { %v715_v9 = vsel %vm396_vm3, %v3326_v3, 0.0 }
 0x324   :  { %719 = vadd.xlane.f32.xlu1 %v718_v6  ;;  %716 = vadd.xlane.f32.xlu0 %v715_v9 }
 0x326   :  { %v3332_v10 = vpop.eup %2752 }
 0x327   :  { %v721_v11 = vsel %vm396_vm3, %v3332_v10, 0.0  ;;  %v3336_v12 = vpop.eup %2754 }
 0x328   :  { %722 = vadd.xlane.f32.xlu0 %v721_v11  ;;  %v724_v14 = vsel %vm396_vm3, %v3336_v12, 0.0 }
 0x32a   :  { %v3340_v61 = vpop.eup %2756 }
 0x32b   :  { %v727_v28 = vsel %vm396_vm3, %v3340_v61, 0.0 }
 0x32c   :  { %725 = vadd.xlane.f32.xlu0 %v724_v14 }
 0x330   :  { %728 = vadd.xlane.f32.xlu0 %v727_v28 }
 0x335   :  { %766 = vrot.lane.b32.xlu1 %v3110_v31, %s2972_s17 }
 0x339   :  { %768 = vrot.lane.b32.xlu1 %v3108_v29, %s2972_s17 }
 0x346   :  { %764 = vrot.lane.b32.xlu0 %v3094_v17, %s2972_s17 }
 0x398   :  { %v450_v15 = vpop.xlane.xlu0 %449 }
 0x399   :  { %v447_v24 = vpop.xlane.xlu1 %446  ;;  %v470_v36 = vmax.f32 %v450_v15, 1e-20 }
 0x39a   :  { %v469_v39 = vmax.f32 %v447_v24, 1e-20 }
 0x39b   :  { %2758 = vrcp.f32 %v470_v36 }
 0x39c   :  { %2760 = vrcp.f32 %v469_v39 }
 0x39d   :  { %v453_v40 = vpop.xlane.xlu1 %452 }
 0x39e   :  { %v471_v53 = vmax.f32 %v453_v40, 1e-20 }
 0x3a0   :  { %v456_v42 = vpop.xlane.xlu0 %455  ;;  %2762 = vrcp.f32 %v471_v53 }
 0x3a1   :  { %v459_v54 = vpop.xlane.xlu1 %458  ;;  %v472_v48 = vmax.f32 %v456_v42, 1e-20 }
 0x3a2   :  { %v473_v56 = vmax.f32 %v459_v54, 1e-20 }
 0x3a3   :  { %2764 = vrcp.f32 %v472_v48 }
 0x3a4   :  { %v462_v29 = vpop.xlane.xlu0 %461  ;;  %2766 = vrcp.f32 %v473_v56 }
 0x3a5   :  { %v2759_v31 = vpop.eup %2758  ;;  %v465_v1 = vpop.xlane.xlu1 %464  ;;  %v474_v19 = vmax.f32 %v462_v29, 1e-20 }
 0x3a6   :  { %v2761_v16 = vpop.eup %2760  ;;  %v486_v17 = vmul.f32 %v2759_v31, %v3269_v27  ;;  %v475_v55 = vmax.f32 %v465_v1, 1e-20 }
 0x3a7   :  { %v485_v57 = vmul.f32 %v2761_v16, %v3271_v44  ;;  %2768 = vrcp.f32 %v474_v19 }
 0x3a8   :  { %2770 = vrcp.f32 %v475_v55 }
 0x3a9   :  { %v708_v58 = vpop.xlane.xlu1 %707  ;;  %v468_v4 = vpop.xlane.xlu0 %467  ;;  %v493_v25 = vpack.c.bf16 %v486_v17, %v485_v57 }
 0x3aa   :  { %v476_v60 = vmax.f32 %v468_v4, 1e-20  ;;  %v730_v47 = vmax.f32 %v708_v58, 1e-20  ;;  %v2763_v2 = vpop.eup %2762 }
 0x3ab   :  { %2526 = vmatprep.mubr.msk.bf16.mxu0 %vm396_vm3, %v493_v25  ;;  %v487_v27 = vmul.f32 %v2763_v2, %v3279_v7 }
 0x3ac   :  { %2772 = vrcp.f32 %v476_v60 }
 0x3ad   :  { %v711_v5 = vpop.xlane.xlu0 %710  ;;  %v2765_v9 = vpop.eup %2764  ;;  %2774 = vrcp.f32 %v730_v47 }
 0x3ae   :  { %v731_v6 = vmax.f32 %v711_v5, 1e-20  ;;  %v488_v11 = vmul.f32 %v2765_v9, %v3287_v22  ;;  %v2767_v44 = vpop.eup %2766  ;;  %v714_v14 = vpop.xlane.xlu1 %713 }
 0x3af   :  { %v489_v36 = vmul.f32 %v2767_v44, %v3285_v30  ;;  %v732_v29 = vmax.f32 %v714_v14, 1e-20 }
 0x3b0   :  { %2776 = vrcp.f32 %v731_v6  ;;  %v494_v15 = vpack.c.bf16 %v488_v11, %v487_v27 }
 0x3b1   :  { %v717_v28 = vpop.xlane.xlu0 %716  ;;  %v2769_v24 = vpop.eup %2768 }
 0x3b2   :  { %2527 = vmatmul.mubr.msk.bf16.vlgmr.msra.gmra.mrb[8].mxu0 %vm396_vm3, %v494_v15  ;;  %v490_v39 = vmul.f32 %v2769_v24, %v3296_v43  ;;  %v2771_v40 = vpop.eup %2770  ;;  %v720_v42 = vpop.xlane.xlu1 %719  ;;  %v733_v22 = vmax.f32 %v717_v28, 1e-20 }
 0x3b3   :  { %2535 = vmatpush3.bf16.msra.mxu0 %v3299_v21  ;;  %v491_v56 = vmul.f32 %v2771_v40, %v3294_v41  ;;  %v734_v16 = vmax.f32 %v720_v42, 1e-20  ;;  %v2721_v42 = vld [vmem:[%s3999_s3 + $0x10] sm:$0xff]  }
 0x3b4   :  { %v495_v54 = vpack.c.bf16 %v490_v39, %v489_v36  ;;  %2778 = vrcp.f32 %v733_v22 }
 0x3b5   :  { %v723_v53 = vpop.xlane.xlu0 %722 }
 0x3b6   :  { %v2773_v7 = vpop.eup %2772  ;;  %v735_v48 = vmax.f32 %v723_v53, 1e-20  ;;  %2530 = vmatprep.mubr.msk.bf16.mxu0 %vm396_vm3, %v495_v54 }
 0x3b7   :  { %v492_v31 = vmul.f32 %v2773_v7, %v3309_v62  ;;  %v2775_v1 = vpop.eup %2774  ;;  %v767_v62 = vpop.permute.xlu1 %766 }
 0x3b8   :  { %2780 = vrcp.f32 %v735_v48  ;;  %v746_v21 = vmul.f32 %v2775_v1, %v3307_v18 }
 0x3b9   :  { %v726_v30 = vpop.xlane.xlu0 %725  ;;  %v496_v43 = vpack.c.bf16 %v492_v31, %v491_v56  ;;  %2782 = vrcp.f32 %v732_v29 }
 0x3ba   :  { %v2777_v19 = vpop.eup %2776  ;;  %2784 = vrcp.f32 %v734_v16  ;;  %v736_v58 = vmax.f32 %v726_v30, 1e-20 }
 0x3bb   :  { %2531 = vmatmul.mubr.msk.bf16.gmra.mrb[12].mxu0 %vm396_vm3, %v496_v43  ;;  %v747_v17 = vmul.f32 %v2777_v19, %v3318_v49  ;;  %v769_v47 = vpop.permute.xlu1 %768 }
 0x3bd   :  { %v729_v55 = vpop.xlane.xlu0 %728  ;;  %v754_v41 = vpack.c.bf16 %v747_v17, %v746_v21 }
 0x3be   :  { %v737_v57 = vmax.f32 %v729_v55, 1e-20  ;;  %v2779_v25 = vpop.eup %2778 }
 0x3bf   :  { %2542 = vmatprep.mubr.msk.bf16.mxu0 %vm396_vm3, %v754_v41  ;;  %v749_v2 = vmul.f32 %v2779_v25, %v3326_v3 }
 0x3c0   :  { %2786 = vrcp.f32 %v737_v57 }
 0x3c1   :  { %v765_v4 = vpop.permute.xlu0 %764  ;;  %2788 = vrcp.f32 %v736_v58 }
 0x3c2   :  { %2536 = vmatprep.subr.bf16.mxu0 %v765_v4  ;;  %v2781_v60 = vpop.eup %2780 }
 0x3c3   :  { %2537 = vmatpush3.bf16.msra.mxu0 %v765_v4  ;;  %v2783_v18 = vpop.eup %2782  ;;  %v751_v5 = vmul.f32 %v2781_v60, %v3332_v10 }
 0x3c4   :  { %2538 = vmatprep.subr.bf16.mxu0 %v767_v62  ;;  %v2785_v49 = vpop.eup %2784  ;;  %v748_v6 = vmul.f32 %v2783_v18, %v3316_v45 }
 0x3c5   :  { %v750_v9 = vmul.f32 %v2785_v49, %v3324_v52 }
 0x3c6   :  { %v755_v27 = vpack.c.bf16 %v749_v2, %v748_v6 }
 0x3c7   :  { %2539 = vmatpush3.bf16.msra.mxu0 %v767_v62  ;;  %v756_v44 = vpack.c.bf16 %v751_v5, %v750_v9 }
 0x3c8   :  { %2540 = vmatprep.subr.bf16.mxu0 %v769_v47 }
 0x3ca   :  { %v2787_v11 = vpop.eup %2786 }
 0x3cb   :  { %2541 = vmatpush3.bf16.msra.mxu0 %v769_v47  ;;  %v2789_v14 = vpop.eup %2788  ;;  %v753_v3 = vmul.f32 %v2787_v11, %v3340_v61 }
 0x3cc   :  { %2562 = vmatprep.subr.bf16.mxu0 %v2969_v13  ;;  %v752_v28 = vmul.f32 %v2789_v14, %v3336_v12  ;;  %v2720_v12 = vld [vmem:[%s3999_s3 + $0x8] sm:$0xff]  }
 0x3cd   :  { %2550 = vmatprep.subr.bf16.mxu1 %v2720_v12 }
 0x3ce   :  { %2543 = vmatmul.mubr.msk.bf16.vlgmr.msra.gmra.mrb[16].mxu0 %vm396_vm3, %v755_v27  ;;  %v757_v10 = vpack.c.bf16 %v753_v3, %v752_v28  ;;  %2551 = vmatpush3.bf16.msra.mxu1 %v2720_v12 }
 0x3cf   :  { %2546 = vmatprep.mubr.msk.bf16.mxu0 %vm396_vm3, %v756_v44  ;;  %2552 = vmatprep.subr.bf16.mxu1 %v2721_v42 }
 0x3d2   :  { %2553 = vmatpush3.bf16.msra.mxu1 %v2721_v42 }
 0x3d6   :  { %2547 = vmatmul.mubr.msk.bf16.gmra.mrb[20].mxu0 %vm396_vm3, %v757_v10 }
 0x3d7   :  { %2570 = vmatprep.mubr.msk.bf16.mxu0 %vm2970_vm1, %v2969_v13 }
 0x485   :  { %v2528_v45 = vpop.f32.mrb[8].mxu0 }
 0x486   :  { %v543_v52 = vpop.f32.mrb[9].mxu0  ;;  %v576_v9 = vmax.f32 %v2528_v45, 0.0 }
 0x487   :  { %v2529_v15 = vpop.f32.mrb[10].mxu0  ;;  %v574_v25 = vmax.f32 %v543_v52, 0.0 }
 0x488   :  { %v546_v24 = vpop.f32.mrb[11].mxu0  ;;  %v577_v27 = vmax.f32 %v2529_v15, 0.0 }
 0x489   :  { %v575_v60 = vmax.f32 %v546_v24, 0.0 }
 0x48e   :  { %v3378_v36 = vpop.f32.mrb[12].mxu0 }
 0x48f   :  { %v3380_v39 = vpop.f32.mrb[13].mxu0  ;;  %v580_v14 = vmax.f32 %v3378_v36, 0.0 }
 0x490   :  { %v3382_v40 = vpop.f32.mrb[14].mxu0  ;;  %v578_v10 = vmax.f32 %v3380_v39, 0.0 }
 0x491   :  { %v3384_v53 = vpop.f32.mrb[15].mxu0  ;;  %v581_v52 = vmax.f32 %v3382_v40, 0.0 }
 0x492   :  { %v579_v24 = vmax.f32 %v3384_v53, 0.0 }
 0x4a1   :  { %v2544_v61 = vpop.f32.mrb[16].mxu0 }
 0x4a2   :  { %v820_v54 = vpop.f32.mrb[17].mxu0  ;;  %v853_v22 = vmax.f32 %v2544_v61, 0.0 }
 0x4a3   :  { %v2545_v7 = vpop.f32.mrb[18].mxu0  ;;  %v851_v31 = vmax.f32 %v820_v54, 0.0 }
 0x4a4   :  { %v854_v48 = vmax.f32 %v2545_v7, 0.0  ;;  %v823_v56 = vpop.f32.mrb[19].mxu0 }
 0x4a5   :  { %v852_v1 = vmax.f32 %v823_v56, 0.0 }
 0x4a6   :  { %v2678_v29 = vpack.i.bf16 %v854_v48, %v853_v22 }
 0x4a7   :  { %v2673_v30 = vpack.i.bf16 %v852_v1, %v851_v31 }
 0x4a9   :  { %2674 = vrot.lane.b32.xlu1 %v2673_v30, %s2973_s22  ;;  %v2548_v16 = vpop.f32.mrb[20].mxu0 }
 0x4aa   :  { %v836_v43 = vpop.f32.mrb[21].mxu0  ;;  %v857_v21 = vmax.f32 %v2548_v16, 0.0 }
 0x4ab   :  { %v2549_v19 = vpop.f32.mrb[22].mxu0  ;;  %v855_v41 = vmax.f32 %v836_v43, 0.0 }
 0x4ac   :  { %v858_v17 = vmax.f32 %v2549_v19, 0.0  ;;  %v839_v55 = vpop.f32.mrb[23].mxu0 }
 0x4ad   :  { %v856_v57 = vmax.f32 %v839_v55, 0.0  ;;  %2679 = vrot.lane.b32.xlu1 %v2678_v29, %s2973_s22 }
 0x4ae   :  { %v2688_v62 = vpack.i.bf16 %v858_v17, %v857_v21 }
 0x4af   :  { %v2683_v58 = vpack.i.bf16 %v856_v57, %v855_v41 }
 0x4b1   :  { %2689 = vrot.lane.b32.xlu1 %v2688_v62, %s2973_s22  ;;  %2684 = vrot.lane.b32.xlu0 %v2683_v58, %s2973_s22 }
 0x51b   :  { %v2675_v4 = vpop.permute.xlu1 %2674 }
 0x51c   :  { %v2677_v18 = vunpack.i.h.bf16 %v2675_v4  ;;  %v2676_v47 = vunpack.i.l.bf16 %v2675_v4 }
 0x51e   :  { %v892_v49 = vsel %vm174_vm0, %v575_v60, %v2677_v18  ;;  %v891_v2 = vsel %vm174_vm0, %v574_v25, %v2676_v47 }
 0x51f   :  { %v2680_v5 = vpop.permute.xlu1 %2679  ;;  %v899_v6 = vpack.c.bf16 %v892_v49, %v891_v2 }
 0x520   :  { %v2682_v11 = vunpack.i.h.bf16 %v2680_v5  ;;  %v2681_v44 = vunpack.i.l.bf16 %v2680_v5 }
 0x521   :  { %2554 = vmatprep.mubr.msk.bf16.mxu1 %vm256_vm2, %v899_v6 }
 0x522   :  { %v894_v3 = vsel %vm174_vm0, %v577_v27, %v2682_v11  ;;  %v893_v28 = vsel %vm174_vm0, %v576_v9, %v2681_v44 }
 0x523   :  { %v900_v12 = vpack.c.bf16 %v894_v3, %v893_v28  ;;  %v2690_v61 = vpop.permute.xlu1 %2689  ;;  %v2685_v45 = vpop.permute.xlu0 %2684 }
 0x524   :  { %v2692_v15 = vunpack.i.h.bf16 %v2690_v61  ;;  %v2691_v54 = vunpack.i.l.bf16 %v2690_v61  ;;  %v2687_v7 = vunpack.i.h.bf16 %v2685_v45  ;;  %v2686_v42 = vunpack.i.l.bf16 %v2685_v45 }
 0x525   :  { %2555 = vmatmul.mubr.msk.bf16.vlgmr.msra.gmra.mrb[4].mxu1 %vm256_vm2, %v900_v12 }
 0x526   :  { %v898_v36 = vsel %vm174_vm0, %v581_v52, %v2692_v15  ;;  %v897_v22 = vsel %vm174_vm0, %v580_v14, %v2691_v54  ;;  %v896_v48 = vsel %vm174_vm0, %v579_v24, %v2687_v7  ;;  %v895_v39 = vsel %vm174_vm0, %v578_v10, %v2686_v42 }
 0x527   :  { %v901_v40 = vpack.c.bf16 %v896_v48, %v895_v39  ;;  %v902_v56 = vpack.c.bf16 %v898_v36, %v897_v22 }
 0x529   :  { %2558 = vmatprep.mubr.msk.bf16.mxu1 %vm256_vm2, %v901_v40 }
 0x52d   :  { %2559 = vmatmul.mubr.msk.bf16.gmra.mrb[8].mxu1 %vm256_vm2, %v902_v56  ;;  %v3454_v56 = vld [vmem:[%s3998_s2 + $0x8] sm:$0xff] }
 0x5f8   :  { %v2556_v53 = vpop.f32.mrb[4].mxu1 }
 0x5f9   :  { %1072 = vperm.xlu1 %2693, %v2556_v53   ;;  %v966_v31 = vpop.f32.mrb[5].mxu1 }
 0x5fa   :  { %1062 = vperm.xlu0 %2694, %v966_v31   ;;  %v2557_v1 = vpop.f32.mrb[6].mxu1 }
 0x5fb   :  { %v3412_v29 = vpack.c.bf16 %v2557_v1, %v2556_v53  ;;  %v969_v30 = vpop.f32.mrb[7].mxu1 }
 0x5fc   :  { %v3414_v16 = vpack.c.bf16 %v969_v30, %v966_v31 }
 0x5fd   :  { %1067 = vperm.xlu1 %2693, %v969_v30   ;;  %v1008_v62 = vsel %vm256_vm2, %v3412_v29, 0 }
 0x5fe   :  { %1077 = vperm.xlu0 %2694, %v2557_v1   ;;  %2574 = vmatprep.subr.bf16.mxu1 %v3414_v16  ;;  %v1005_v43 = vsel %vm256_vm2, %v3414_v16, 0 }
 0x5ff   :  { %2563 = vmatpush3.bf16.xpose.msra.mxu0 %v1005_v43  ;;  %2575 = vmatpush3.bf16.msra.mxu1 %v3414_v16 }
 0x600   :  { %v2560_v19 = vpop.f32.mrb[8].mxu1  ;;  %2576 = vmatprep.subr.bf16.mxu1 %v3412_v29  ;;  %2564 = vmatprep.subr.bf16.mxu0 %v2969_v13 }
 0x601   :  { %1092 = vperm.xlu1 %2693, %v2560_v19   ;;  %v982_v21 = vpop.f32.mrb[9].mxu1 }
 0x602   :  { %v2561_v17 = vpop.f32.mrb[10].mxu1 }
 0x603   :  { %v3422_v55 = vpack.c.bf16 %v2561_v17, %v2560_v19  ;;  %2577 = vmatpush3.bf16.msra.mxu1 %v3412_v29  ;;  %1097 = vperm.xlu0 %2694, %v2561_v17   ;;  %v985_v41 = vpop.f32.mrb[11].mxu1 }
 0x604   :  { %v3425_v57 = vpack.c.bf16 %v985_v41, %v982_v21 }
 0x605   :  { %1082 = vperm.xlu1 %2693, %v982_v21   ;;  %v1014_v4 = vsel %vm256_vm2, %v3422_v55, 0 }
 0x606   :  { %2578 = vmatprep.subr.bf16.mxu1 %v3425_v57  ;;  %v1011_v58 = vsel %vm256_vm2, %v3425_v57, 0 }
 0x607   :  { %2565 = vmatpush3.bf16.xpose.msra.mxu0 %v1008_v62  ;;  %1087 = vperm.xlu0 %2694, %v985_v41  }
 0x608   :  { %2579 = vmatpush3.bf16.msra.mxu1 %v3425_v57  ;;  %2566 = vmatprep.subr.bf16.mxu0 %v2969_v13 }
 0x609   :  { %2580 = vmatprep.subr.bf16.mxu1 %v3422_v55  ;;  %2695 = vset.pattern.permute.xlu1 %v2971_v34 }
 0x60a   :  { %1330 = vperm.xlu1 %2695, %v966_v31   ;;  %v3462_v31 = vld [vmem:[%s3998_s2] sm:$0xff] }
 0x60b   :  { %2696 = vset.pattern.permute.xlu0 %v2971_v34  ;;  %v907_v34 = vld [vmem:[%s3999_s3 + $0x40] sm:$0x1] }
 0x60c   :  { %2581 = vmatpush3.bf16.msra.mxu1 %v3422_v55  ;;  %1334 = vperm.xlu0 %2696, %v969_v30  }
 0x60e   :  { %1338 = vperm.xlu1 %2695, %v2556_v53  }
 0x60f   :  { %2567 = vmatpush3.bf16.xpose.msra.mxu0 %v1011_v58 }
 0x610   :  { %1346 = vperm.xlu0 %2696, %v982_v21   ;;  %2568 = vmatprep.subr.bf16.mxu0 %v2969_v13 }
 0x612   :  { %1342 = vperm.xlu1 %2695, %v2557_v1  }
 0x614   :  { %1354 = vperm.xlu0 %2696, %v2560_v19   ;;  %v3470_v19 = vld [vmem:[%s3998_s2 + $0x20] sm:$0xff] }
 0x616   :  { %1350 = vperm.xlu1 %2695, %v985_v41  }
 0x617   :  { %2569 = vmatpush3.bf16.xpose.msra.mxu0 %v1014_v4 }
 0x61a   :  { %1358 = vperm.xlu1 %2695, %v2561_v17   ;;  %v3478_v17 = vld [vmem:[%s3998_s2 + $0x10] sm:$0xff] }
 0x61e   :  { %2571 = vmatmul.mubr.msk.bf16.vlgmr.msra.gmra.mrb[24].mxu0 %vm256_vm2, %v907_v34 }
 0x678   :  { %v1073_v25 = vpop.permute.xlu1 %1072 }
 0x679   :  { %v1063_v60 = vpop.permute.xlu0 %1062 }
 0x67c   :  { %v1068_v18 = vpop.permute.xlu1 %1067 }
 0x67d   :  { %v1078_v47 = vpop.permute.xlu0 %1077 }
 0x680   :  { %v1093_v49 = vpop.permute.xlu1 %1092 }
 0x682   :  { %v1098_v2 = vpop.permute.xlu0 %1097 }
 0x684   :  { %v1083_v5 = vpop.permute.xlu1 %1082 }
 0x686   :  { %v1088_v6 = vpop.permute.xlu0 %1087 }
 0x689   :  { %v1331_v14 = vpop.permute.xlu1 %1330 }
 0x68b   :  { %v1335_v20 = vpop.permute.xlu0 %1334 }
 0x68d   :  { %v1339_v40 = vpop.permute.xlu1 %1338 }
 0x6f1   :  { %v1050_v9 = vpop.f32.mrb[24].mxu0 }
 0x6f2   :  { %v1059_v27 = vrot.slane %v1050_v9, %v3036_v23  ;;  %v3448_v11 = vrot.slane %v1050_v9, %v584_v46  ;;  %v2572_v44 = vpop.f32.mrb[25].mxu0 }
 0x6f3   :  { %v1053_v3 = vpop.f32.mrb[26].mxu0  ;;  %v1343_v44 = vpop.permute.xlu1 %1342 }
 0x6f4   :  { %v2573_v28 = vpop.f32.mrb[27].mxu0  ;;  %v1101_v10 = vadd.f32 %v1068_v18, %v1059_v27  ;;  %v1100_v52 = vadd.f32 %v1063_v60, %v1059_v27  ;;  %v1104_v24 = vadd.f32 %v1083_v5, %v1059_v27  ;;  %v1102_v12 = vadd.f32 %v1073_v25, %v1059_v27  ;;  %v1347_v60 = vpop.permute.xlu0 %1346 }
 0x6f5   :  { %v1106_v61 = vadd.f32 %v1093_v49, %v1059_v27  ;;  %v1103_v45 = vadd.f32 %v1078_v47, %v1059_v27  ;;  %v1361_v15 = vadd.f32 %v1331_v14, %v3448_v11  ;;  %v1105_v54 = vadd.f32 %v1088_v6, %v1059_v27 }
 0x6f6   :  { %vm1109_vm8 = vcmp.gt.f32.partialorder %v1101_v10, 0.0  ;;  %v1117_v7 = vmul.f32 0.2, %v1101_v10  ;;  %vm1108_vm9 = vcmp.gt.f32.partialorder %v1100_v52, 0.0  ;;  %v1116_v42 = vmul.f32 0.2, %v1100_v52 }
 0x6f7   :  { %vm1112_vm10 = vcmp.gt.f32.partialorder %v1104_v24, 0.0  ;;  %v1120_v46 = vmul.f32 0.2, %v1104_v24  ;;  %vm1110_vm11 = vcmp.gt.f32.partialorder %v1102_v12, 0.0  ;;  %v1118_v36 = vmul.f32 0.2, %v1102_v12 }
 0x6f8   :  { %v1125_v22 = vsel %vm1109_vm8, %v1101_v10, %v1117_v7  ;;  %v1124_v48 = vsel %vm1108_vm9, %v1100_v52, %v1116_v42  ;;  %vm1114_vm12 = vcmp.gt.f32.partialorder %v1106_v61, 0.0  ;;  %v1122_v39 = vmul.f32 0.2, %v1106_v61 }
 0x6f9   :  { %v3457_v53 = vadd.f32 %v3454_v56, %v1125_v22  ;;  %v3465_v1 = vadd.f32 %v3462_v31, %v1124_v48  ;;  %v1128_v30 = vsel %vm1112_vm10, %v1104_v24, %v1120_v46  ;;  %v1126_v43 = vsel %vm1110_vm11, %v1102_v12, %v1118_v36  ;;  %v1351_v36 = vpop.permute.xlu1 %1350 }
 0x6fa   :  { %v3473_v21 = vadd.f32 %v3470_v19, %v1128_v30  ;;  %v3481_v41 = vadd.f32 %v3478_v17, %v1126_v43  ;;  %vm1111_vm13 = vcmp.gt.f32.partialorder %v1103_v45, 0.0  ;;  %v1130_v4 = vsel %vm1114_vm12, %v1106_v61, %v1122_v39  ;;  %v1355_v61 = vpop.permute.xlu0 %1354 }
 0x6fb   :  { %v1143_v62 = vsel %vm396_vm3, %v3457_v53, -inf  ;;  %v1140_v58 = vsel %vm396_vm3, %v3465_v1, -inf  ;;  %v1119_v34 = vmul.f32 0.2, %v1103_v45  ;;  %vm1369_vm14 = vcmp.gt.f32.partialorder %v1361_v15, 0.0 }
 0x6fc   :  { %1144 = vmax.xlane.f32.xlu1 %v1143_v62  ;;  %1141 = vmax.xlane.f32.xlu0 %v1140_v58  ;;  %v1377_v25 = vmul.f32 0.2, %v1361_v15  ;;  %vm1113_vm15 = vcmp.gt.f32.partialorder %v1105_v54, 0.0  ;;  %v1121_v47 = vmul.f32 0.2, %v1105_v54  ;;  %v3489_v49 = vadd.f32 %v1130_v4, %v3172_v32 }
 0x6fd   :  { %v1127_v18 = vsel %vm1111_vm13, %v1103_v45, %v1119_v34  ;;  %v1363_v6 = vadd.f32 %v1339_v40, %v3448_v11  ;;  %v1107_v9 = vadd.f32 %v1098_v2, %v1059_v27  ;;  %v1152_v14 = vsel %vm396_vm3, %v3473_v21, -inf  ;;  %v1359_v4 = vpop.permute.xlu1 %1358 }
 0x6fe   :  { %v3492_v5 = vadd.f32 %v1127_v18, %v3177_v37  ;;  %v1146_v3 = vsel %vm396_vm3, %v3481_v41, -inf  ;;  %v1385_v28 = vsel %vm1369_vm14, %v1361_v15, %v1377_v25  ;;  %v1365_v10 = vadd.f32 %v1347_v60, %v3448_v11 }
 0x6ff   :  { %v1129_v32 = vsel %vm1113_vm15, %v1105_v54, %v1121_v47  ;;  %vm1371_vm4 = vcmp.gt.f32.partialorder %v1363_v6, 0.0  ;;  %v1379_v52 = vmul.f32 0.2, %v1363_v6  ;;  %v1362_v37 = vadd.f32 %v1335_v20, %v3448_v11 }
 0x700   :  { %1153 = vmax.xlane.f32.xlu1 %v1152_v14  ;;  %1147 = vmax.xlane.f32.xlu0 %v1146_v3  ;;  %vm1115_vm5 = vcmp.gt.f32.partialorder %v1107_v9, 0.0  ;;  %v1123_v24 = vmul.f32 0.2, %v1107_v9  ;;  %v1158_v2 = vsel %vm396_vm3, %v3489_v49, -inf  ;;  %v1149_v27 = vsel %vm396_vm3, %v3492_v5, -inf }
 0x701   :  { %v3506_v12 = vadd.f32 %v3462_v31, %v1385_v28  ;;  %v3509_v45 = vadd.f32 %v1129_v32, %v3194_v59  ;;  %v1387_v15 = vsel %vm1371_vm4, %v1363_v6, %v1379_v52  ;;  %vm1373_vm6 = vcmp.gt.f32.partialorder %v1365_v10, 0.0  ;;  %v3550_v28 = vld [vmem:[%s3998_s2 + $0x18] sm:$0xff] }
 0x702   :  { %v1381_v54 = vmul.f32 0.2, %v1365_v10  ;;  %v1131_v7 = vsel %vm1115_vm5, %v1107_v9, %v1123_v24  ;;  %v1378_v42 = vmul.f32 0.2, %v1362_v37  ;;  %v1367_v20 = vadd.f32 %v1355_v61, %v3448_v11  ;;  %v3562_v24 = vld [vmem:[%s3998_s2 + $0x28] sm:$0xff] }
 0x703   :  { %v1364_v46 = vadd.f32 %v1343_v44, %v3448_v11  ;;  %vm1370_vm7 = vcmp.gt.f32.partialorder %v1362_v37, 0.0  ;;  %v1401_v22 = vsel %vm396_vm3, %v3506_v12, -inf  ;;  %v1155_v59 = vsel %vm396_vm3, %v3509_v45, -inf }
 0x704   :  { %1159 = vmax.xlane.f32.xlu1 %v1158_v2  ;;  %1150 = vmax.xlane.f32.xlu0 %v1149_v27  ;;  %v3518_v48 = vadd.f32 %v3478_v17, %v1387_v15  ;;  %v3521_v39 = vadd.f32 %v1131_v7, %v3209_v8  ;;  %v1389_v40 = vsel %vm1373_vm6, %v1365_v10, %v1381_v54  ;;  %v1383_v43 = vmul.f32 0.2, %v1367_v20  ;;  %v3572_v15 = vld [vmem:[%s3998_s2 + $0x38] sm:$0xff] }
 0x705   :  { %v1386_v30 = vsel %vm1370_vm7, %v1362_v37, %v1378_v42  ;;  %v1380_v62 = vmul.f32 0.2, %v1364_v46  ;;  %v1366_v58 = vadd.f32 %v1351_v36, %v3448_v11  ;;  %vm1375_vm8 = vcmp.gt.f32.partialorder %v1367_v20, 0.0 }
 0x706   :  { %vm1372_vm9 = vcmp.gt.f32.partialorder %v1364_v46, 0.0  ;;  %v1407_v34 = vsel %vm396_vm3, %v3518_v48, -inf  ;;  %v1161_v25 = vsel %vm396_vm3, %v3521_v39, -inf  ;;  %v3529_v8 = vadd.f32 %v3470_v19, %v1389_v40  ;;  %v3542_v19 = vld [vmem:[%s3998_s2 + $0x30] sm:$0xff] }
 0x707   :  { %v3532_v60 = vadd.f32 %v3454_v56, %v1386_v30  ;;  %v1391_v18 = vsel %vm1375_vm8, %v1367_v20, %v1383_v43  ;;  %v1388_v47 = vsel %vm1372_vm9, %v1364_v46, %v1380_v62  ;;  %v1382_v6 = vmul.f32 0.2, %v1366_v58 }
 0x708   :  { %1402 = vmax.xlane.f32.xlu1 %v1401_v22  ;;  %1156 = vmax.xlane.f32.xlu0 %v1155_v59  ;;  %v1368_v9 = vadd.f32 %v1359_v4, %v3448_v11  ;;  %vm1374_vm10 = vcmp.gt.f32.partialorder %v1366_v58, 0.0  ;;  %v1413_v44 = vsel %vm396_vm3, %v3529_v8, -inf  ;;  %v3545_v3 = vadd.f32 %v3542_v19, %v1391_v18 }
 0x709   :  { %v1404_v14 = vsel %vm396_vm3, %v3532_v60, -inf  ;;  %v3553_v11 = vadd.f32 %v3550_v28, %v1388_v47  ;;  %v1390_v10 = vsel %vm1374_vm10, %v1366_v58, %v1382_v6 }
 0x70a   :  { %v1384_v32 = vmul.f32 0.2, %v1368_v9  ;;  %vm1376_vm11 = vcmp.gt.f32.partialorder %v1368_v9, 0.0  ;;  %v1419_v52 = vsel %vm396_vm3, %v3545_v3, -inf  ;;  %v3565_v2 = vadd.f32 %v3562_v24, %v1390_v10 }
 0x70b   :  { %v1410_v37 = vsel %vm396_vm3, %v3553_v11, -inf }
 0x70c   :  { %1408 = vmax.xlane.f32.xlu1 %v1407_v34  ;;  %1162 = vmax.xlane.f32.xlu0 %v1161_v25  ;;  %v1392_v27 = vsel %vm1376_vm11, %v1368_v9, %v1384_v32  ;;  %v1416_v61 = vsel %vm396_vm3, %v3565_v2, -inf }
 0x70d   :  { %v3575_v54 = vadd.f32 %v3572_v15, %v1392_v27 }
 0x70f   :  { %v1422_v7 = vsel %vm396_vm3, %v3575_v54, -inf }
 0x710   :  { %1414 = vmax.xlane.f32.xlu1 %v1413_v44  ;;  %1405 = vmax.xlane.f32.xlu0 %v1404_v14 }
 0x714   :  { %1420 = vmax.xlane.f32.xlu1 %v1419_v52  ;;  %1411 = vmax.xlane.f32.xlu0 %v1410_v37 }
 0x718   :  { %1417 = vmax.xlane.f32.xlu0 %v1416_v61 }
 0x71c   :  { %1423 = vmax.xlane.f32.xlu0 %v1422_v7 }
 0x725   :  { %1505 = vrot.lane.b32.xlu1 %v3414_v16, %s2972_s17 }
 0x789   :  { %v1145_v42 = vpop.xlane.xlu1 %1144  ;;  %v1142_v20 = vpop.xlane.xlu0 %1141 }
 0x78a   :  { %v1165_v46 = vsub.f32 %v3457_v53, %v1145_v42  ;;  %v1164_v36 = vsub.f32 %v3465_v1, %v1142_v20 }
 0x78c   :  { %v1174_v22 = vmul.f32 1.442695, %v1165_v46  ;;  %v1172_v59 = vmul.f32 1.442695, %v1164_v36 }
 0x78d   :  { %v1154_v40 = vpop.xlane.xlu1 %1153  ;;  %v1148_v30 = vpop.xlane.xlu0 %1147 }
 0x78e   :  { %2790 = vpow2.f32 %v1174_v22  ;;  %v1168_v43 = vsub.f32 %v3473_v21, %v1154_v40  ;;  %v1166_v62 = vsub.f32 %v3481_v41, %v1148_v30 }
 0x78f   :  { %2792 = vpow2.f32 %v1172_v59 }
 0x790   :  { %v1176_v58 = vmul.f32 1.442695, %v1166_v62  ;;  %v1180_v4 = vmul.f32 1.442695, %v1168_v43 }
 0x791   :  { %v1160_v34 = vpop.xlane.xlu1 %1159  ;;  %v1151_v16 = vpop.xlane.xlu0 %1150 }
 0x792   :  { %v1170_v25 = vsub.f32 %v3489_v49, %v1160_v34  ;;  %v1167_v53 = vsub.f32 %v3492_v5, %v1151_v16  ;;  %2794 = vpow2.f32 %v1176_v58 }
 0x793   :  { %2796 = vpow2.f32 %v1180_v4 }
 0x794   :  { %v1178_v1 = vmul.f32 1.442695, %v1167_v53  ;;  %v1184_v18 = vmul.f32 1.442695, %v1170_v25 }
 0x795   :  { %v1403_v47 = vpop.xlane.xlu1 %1402  ;;  %v1157_v6 = vpop.xlane.xlu0 %1156 }
 0x796   :  { %v1425_v9 = vsub.f32 %v3506_v12, %v1403_v47  ;;  %v1169_v21 = vsub.f32 %v3509_v45, %v1157_v6  ;;  %2798 = vpow2.f32 %v1178_v1 }
 0x797   :  { %2800 = vpow2.f32 %v1184_v18 }
 0x798   :  { %v3589_v41 = vpop.eup %2790  ;;  %v1182_v44 = vmul.f32 1.442695, %v1169_v21  ;;  %v1433_v49 = vmul.f32 1.442695, %v1425_v9 }
 0x799   :  { %v3591_v14 = vpop.eup %2792  ;;  %v1409_v10 = vpop.xlane.xlu1 %1408  ;;  %v1191_v32 = vsel %vm396_vm3, %v3589_v41, 0.0 }
 0x79a   :  { %v1163_v5 = vpop.xlane.xlu0 %1162  ;;  %v1427_v52 = vsub.f32 %v3518_v48, %v1409_v10  ;;  %1192 = vadd.xlane.f32.xlu0 %v1191_v32  ;;  %v1188_v12 = vsel %vm396_vm3, %v3591_v14, 0.0  ;;  %2802 = vpow2.f32 %v1182_v44 }
 0x79b   :  { %v1171_v37 = vsub.f32 %v3521_v39, %v1163_v5  ;;  %1189 = vadd.xlane.f32.xlu1 %v1188_v12  ;;  %2804 = vpow2.f32 %v1433_v49 }
 0x79c   :  { %v3599_v27 = vpop.eup %2794  ;;  %v1437_v61 = vmul.f32 1.442695, %v1427_v52 }
 0x79d   :  { %v1186_v45 = vmul.f32 1.442695, %v1171_v37  ;;  %v1415_v7 = vpop.xlane.xlu1 %1414  ;;  %v1194_v48 = vsel %vm396_vm3, %v3599_v27, 0.0  ;;  %v3605_v39 = vpop.eup %2796 }
 0x79e   :  { %v1406_v42 = vpop.xlane.xlu0 %1405  ;;  %v1429_v20 = vsub.f32 %v3529_v8, %v1415_v7  ;;  %v1200_v8 = vsel %vm396_vm3, %v3605_v39, 0.0 }
 0x79f   :  { %v1426_v46 = vsub.f32 %v3532_v60, %v1406_v42  ;;  %2806 = vpow2.f32 %v1186_v45  ;;  %1195 = vadd.xlane.f32.xlu1 %v1194_v48 }
 0x7a0   :  { %v3607_v22 = vpop.eup %2798  ;;  %2808 = vpow2.f32 %v1437_v61  ;;  %v1441_v59 = vmul.f32 1.442695, %v1429_v20 }
 0x7a1   :  { %v1435_v36 = vmul.f32 1.442695, %v1426_v46  ;;  %v1421_v40 = vpop.xlane.xlu1 %1420  ;;  %v1197_v60 = vsel %vm396_vm3, %v3607_v22, 0.0  ;;  %v3614_v62 = vpop.eup %2800 }
 0x7a2   :  { %v1412_v30 = vpop.xlane.xlu0 %1411  ;;  %1198 = vadd.xlane.f32.xlu0 %v1197_v60  ;;  %v1431_v34 = vsub.f32 %v3545_v3, %v1421_v40  ;;  %v1206_v53 = vsel %vm396_vm3, %v3614_v62, 0.0 }
 0x7a3   :  { %v1428_v43 = vsub.f32 %v3553_v11, %v1412_v30  ;;  %2810 = vpow2.f32 %v1435_v36  ;;  %1201 = vadd.xlane.f32.xlu1 %v1200_v8 }
 0x7a4   :  { %v3616_v4 = vpop.eup %2802  ;;  %2812 = vpow2.f32 %v1441_v59  ;;  %v1445_v6 = vmul.f32 1.442695, %v1431_v34 }
 0x7a5   :  { %v1439_v58 = vmul.f32 1.442695, %v1428_v43  ;;  %v3619_v16 = vpop.permute.xlu1 %1505  ;;  %v1203_v1 = vsel %vm396_vm3, %v3616_v4, 0.0  ;;  %v3627_v18 = vpop.eup %2804 }
 0x7a6   :  { %v1418_v11 = vpop.xlane.xlu0 %1417  ;;  %2590 = vmatprep.subr.bf16.mxu1 %v3619_v16  ;;  %1204 = vadd.xlane.f32.xlu0 %v1203_v1  ;;  %v1449_v21 = vsel %vm396_vm3, %v3627_v18, 0.0 }
 0x7a7   :  { %v1430_v25 = vsub.f32 %v3565_v2, %v1418_v11  ;;  %2814 = vpow2.f32 %v1439_v58  ;;  %1207 = vadd.xlane.f32.xlu1 %v1206_v53 }
 0x7a9   :  { %v1443_v47 = vmul.f32 1.442695, %v1430_v25  ;;  %v3629_v3 = vpop.eup %2806 }
 0x7aa   :  { %v1424_v9 = vpop.xlane.xlu0 %1423  ;;  %v1209_v44 = vsel %vm396_vm3, %v3629_v3, 0.0  ;;  %v3636_v49 = vpop.eup %2808 }
 0x7ab   :  { %2816 = vpow2.f32 %v1443_v47  ;;  %v1432_v2 = vsub.f32 %v3575_v54, %v1424_v9  ;;  %1450 = vadd.xlane.f32.xlu1 %v1449_v21  ;;  %1210 = vadd.xlane.f32.xlu0 %v1209_v44  ;;  %v1455_v32 = vsel %vm396_vm3, %v3636_v49, 0.0 }
 0x7ac   :  { %2818 = vpow2.f32 %v1445_v6 }
 0x7ad   :  { %v3638_v10 = vpop.eup %2810  ;;  %v1447_v5 = vmul.f32 1.442695, %v1432_v2 }
 0x7ae   :  { %v1452_v54 = vsel %vm396_vm3, %v3638_v10, 0.0  ;;  %v3644_v52 = vpop.eup %2812 }
 0x7af   :  { %1456 = vadd.xlane.f32.xlu1 %v1455_v32  ;;  %1453 = vadd.xlane.f32.xlu0 %v1452_v54  ;;  %2820 = vpow2.f32 %v1447_v5  ;;  %v1461_v12 = vsel %vm396_vm3, %v3644_v52, 0.0 }
 0x7b1   :  { %v3646_v37 = vpop.eup %2814 }
 0x7b2   :  { %v1458_v45 = vsel %vm396_vm3, %v3646_v37, 0.0 }
 0x7b3   :  { %1462 = vadd.xlane.f32.xlu1 %v1461_v12  ;;  %1459 = vadd.xlane.f32.xlu0 %v1458_v45 }
 0x7b5   :  { %v3652_v61 = vpop.eup %2816 }
 0x7b6   :  { %v1464_v7 = vsel %vm396_vm3, %v3652_v61, 0.0  ;;  %v3656_v42 = vpop.eup %2818 }
 0x7b7   :  { %1465 = vadd.xlane.f32.xlu0 %v1464_v7  ;;  %v1467_v20 = vsel %vm396_vm3, %v3656_v42, 0.0 }
 0x7b9   :  { %v3660_v46 = vpop.eup %2820 }
 0x7ba   :  { %v1470_v48 = vsel %vm396_vm3, %v3660_v46, 0.0 }
 0x7bb   :  { %1468 = vadd.xlane.f32.xlu0 %v1467_v20 }
 0x7bf   :  { %1471 = vadd.xlane.f32.xlu0 %v1470_v48 }
 0x7c4   :  { %1509 = vrot.lane.b32.xlu1 %v3425_v57, %s2972_s17 }
 0x7c8   :  { %1511 = vrot.lane.b32.xlu1 %v3422_v55, %s2972_s17 }
 0x7d5   :  { %1507 = vrot.lane.b32.xlu0 %v3412_v29, %s2972_s17 }
 0x827   :  { %v1193_v36 = vpop.xlane.xlu0 %1192 }
 0x828   :  { %v1190_v59 = vpop.xlane.xlu1 %1189  ;;  %v1213_v40 = vmax.f32 %v1193_v36, 1e-20 }
 0x829   :  { %v1212_v30 = vmax.f32 %v1190_v59, 1e-20 }
 0x82a   :  { %2822 = vrcp.f32 %v1213_v40 }
 0x82b   :  { %2824 = vrcp.f32 %v1212_v30 }
 0x82c   :  { %v1196_v43 = vpop.xlane.xlu1 %1195 }
 0x82d   :  { %v1214_v8 = vmax.f32 %v1196_v43, 1e-20 }
 0x82f   :  { %v1199_v58 = vpop.xlane.xlu0 %1198  ;;  %2826 = vrcp.f32 %v1214_v8 }
 0x830   :  { %v1202_v60 = vpop.xlane.xlu1 %1201  ;;  %v1215_v34 = vmax.f32 %v1199_v58, 1e-20 }
 0x831   :  { %v1216_v11 = vmax.f32 %v1202_v60, 1e-20 }
 0x832   :  { %2828 = vrcp.f32 %v1215_v34 }
 0x833   :  { %v1205_v55 = vpop.xlane.xlu0 %1204  ;;  %2830 = vrcp.f32 %v1216_v11 }
 0x834   :  { %v2823_v57 = vpop.eup %2822  ;;  %v1208_v25 = vpop.xlane.xlu1 %1207  ;;  %v1217_v1 = vmax.f32 %v1205_v55, 1e-20 }
 0x835   :  { %v2825_v53 = vpop.eup %2824  ;;  %v1229_v29 = vmul.f32 %v2823_v57, %v3589_v41  ;;  %v1218_v47 = vmax.f32 %v1208_v25, 1e-20 }
 0x836   :  { %v1228_v6 = vmul.f32 %v2825_v53, %v3591_v14  ;;  %2832 = vrcp.f32 %v1217_v1 }
 0x837   :  { %2834 = vrcp.f32 %v1218_v47 }
 0x838   :  { %v1451_v9 = vpop.xlane.xlu1 %1450  ;;  %v1211_v2 = vpop.xlane.xlu0 %1210  ;;  %v1236_v21 = vpack.c.bf16 %v1229_v29, %v1228_v6 }
 0x839   :  { %v1219_v44 = vmax.f32 %v1211_v2, 1e-20  ;;  %v1473_v5 = vmax.f32 %v1451_v9, 1e-20  ;;  %v2827_v32 = vpop.eup %2826 }
 0x83a   :  { %2582 = vmatprep.mubr.msk.bf16.mxu1 %vm396_vm3, %v1236_v21  ;;  %v1230_v41 = vmul.f32 %v2827_v32, %v3599_v27 }
 0x83b   :  { %2836 = vrcp.f32 %v1219_v44 }
 0x83c   :  { %v1454_v54 = vpop.xlane.xlu0 %1453  ;;  %v2829_v45 = vpop.eup %2828  ;;  %2838 = vrcp.f32 %v1473_v5 }
 0x83d   :  { %v1474_v12 = vmax.f32 %v1454_v54, 1e-20  ;;  %v1231_v7 = vmul.f32 %v2829_v45, %v3607_v22  ;;  %v2831_v14 = vpop.eup %2830  ;;  %v1457_v20 = vpop.xlane.xlu1 %1456 }
 0x83e   :  { %v1232_v40 = vmul.f32 %v2831_v14, %v3605_v39  ;;  %v1475_v55 = vmax.f32 %v1457_v20, 1e-20 }
 0x83f   :  { %2840 = vrcp.f32 %v1474_v12  ;;  %v1237_v36 = vpack.c.bf16 %v1231_v7, %v1230_v41 }
 0x840   :  { %v1460_v48 = vpop.xlane.xlu0 %1459  ;;  %v2833_v59 = vpop.eup %2832 }
 0x841   :  { %2583 = vmatmul.mubr.msk.bf16.vlgmr.msra.gmra.mrb[12].mxu1 %vm396_vm3, %v1237_v36  ;;  %v1233_v30 = vmul.f32 %v2833_v59, %v3616_v4  ;;  %v2835_v43 = vpop.eup %2834  ;;  %v1463_v58 = vpop.xlane.xlu1 %1462  ;;  %v1476_v22 = vmax.f32 %v1460_v48, 1e-20 }
 0x842   :  { %2591 = vmatpush3.bf16.msra.mxu1 %v3619_v16  ;;  %v1234_v11 = vmul.f32 %v2835_v43, %v3614_v62  ;;  %v1477_v53 = vmax.f32 %v1463_v58, 1e-20  ;;  %v2723_v58 = vld [vmem:[%s3999_s3 + $0x20] sm:$0xff]  }
 0x843   :  { %v1238_v60 = vpack.c.bf16 %v1233_v30, %v1232_v40  ;;  %2842 = vrcp.f32 %v1476_v22 }
 0x844   :  { %v1466_v8 = vpop.xlane.xlu0 %1465 }
 0x845   :  { %v2837_v27 = vpop.eup %2836  ;;  %v1478_v34 = vmax.f32 %v1466_v8, 1e-20  ;;  %2586 = vmatprep.mubr.msk.bf16.mxu1 %vm396_vm3, %v1238_v60 }
 0x846   :  { %v1235_v57 = vmul.f32 %v2837_v27, %v3629_v3  ;;  %v2839_v25 = vpop.eup %2838  ;;  %v1510_v3 = vpop.permute.xlu1 %1509 }
 0x847   :  { %2844 = vrcp.f32 %v1478_v34  ;;  %v1489_v16 = vmul.f32 %v2839_v25, %v3627_v18 }
 0x848   :  { %v1469_v39 = vpop.xlane.xlu0 %1468  ;;  %v1239_v4 = vpack.c.bf16 %v1235_v57, %v1234_v11  ;;  %2846 = vrcp.f32 %v1475_v55 }
 0x849   :  { %v2841_v1 = vpop.eup %2840  ;;  %2848 = vrcp.f32 %v1477_v53  ;;  %v1479_v9 = vmax.f32 %v1469_v39, 1e-20 }
 0x84a   :  { %2587 = vmatmul.mubr.msk.bf16.gmra.mrb[16].mxu1 %vm396_vm3, %v1239_v4  ;;  %v1490_v29 = vmul.f32 %v2841_v1, %v3638_v10  ;;  %v1512_v5 = vpop.permute.xlu1 %1511 }
 0x84c   :  { %v1472_v47 = vpop.xlane.xlu0 %1471  ;;  %v1497_v62 = vpack.c.bf16 %v1490_v29, %v1489_v16 }
 0x84d   :  { %v1480_v6 = vmax.f32 %v1472_v47, 1e-20  ;;  %v2843_v21 = vpop.eup %2842 }
 0x84e   :  { %2598 = vmatprep.mubr.msk.bf16.mxu1 %vm396_vm3, %v1497_v62  ;;  %v1492_v32 = vmul.f32 %v2843_v21, %v3646_v37 }
 0x84f   :  { %2850 = vrcp.f32 %v1480_v6 }
 0x850   :  { %v1508_v2 = vpop.permute.xlu0 %1507  ;;  %2852 = vrcp.f32 %v1479_v9 }
 0x851   :  { %2592 = vmatprep.subr.bf16.mxu1 %v1508_v2  ;;  %v2845_v44 = vpop.eup %2844 }
 0x852   :  { %2593 = vmatpush3.bf16.msra.mxu1 %v1508_v2  ;;  %v2847_v18 = vpop.eup %2846  ;;  %v1494_v54 = vmul.f32 %v2845_v44, %v3652_v61 }
 0x853   :  { %2594 = vmatprep.subr.bf16.mxu1 %v1510_v3  ;;  %v2849_v10 = vpop.eup %2848  ;;  %v1491_v12 = vmul.f32 %v2847_v18, %v3636_v49 }
 0x854   :  { %v1493_v45 = vmul.f32 %v2849_v10, %v3644_v52 }
 0x855   :  { %v1498_v41 = vpack.c.bf16 %v1492_v32, %v1491_v12 }
 0x856   :  { %2595 = vmatpush3.bf16.msra.mxu1 %v1510_v3  ;;  %v1499_v14 = vpack.c.bf16 %v1494_v54, %v1493_v45  ;;  %v2724_v3 = vld [vmem:[%s3999_s3 + $0x28] sm:$0xff]  }
 0x857   :  { %2596 = vmatprep.subr.bf16.mxu1 %v1512_v5 }
 0x859   :  { %v2851_v7 = vpop.eup %2850 }
 0x85a   :  { %2597 = vmatpush3.bf16.msra.mxu1 %v1512_v5  ;;  %v2853_v20 = vpop.eup %2852  ;;  %v1496_v48 = vmul.f32 %v2851_v7, %v3660_v46  ;;  %v2722_v46 = vld [vmem:[%s3999_s3 + $0x18] sm:$0xff]  }
 0x85b   :  { %v1495_v37 = vmul.f32 %v2853_v20, %v3656_v42  ;;  %2606 = vmatprep.subr.bf16.mxu0 %v2722_v46  ;;  %2618 = vmatprep.subr.bf16.mxu1 %v2724_v3 }
 0x85c   :  { %2607 = vmatpush3.bf16.msra.mxu0 %v2722_v46 }
 0x85d   :  { %2599 = vmatmul.mubr.msk.bf16.vlgmr.msra.gmra.mrb[20].mxu1 %vm396_vm3, %v1498_v41  ;;  %v1500_v36 = vpack.c.bf16 %v1496_v48, %v1495_v37  ;;  %2608 = vmatprep.subr.bf16.mxu0 %v2723_v58 }
 0x85e   :  { %2602 = vmatprep.mubr.msk.bf16.mxu1 %vm396_vm3, %v1499_v14  ;;  %2619 = vmatpush3.bf16.msra.mxu1 %v2724_v3 }
 0x860   :  { %2609 = vmatpush3.bf16.msra.mxu0 %v2723_v58 }
 0x861   :  { %2630 = vmatprep.subr.bf16.mxu0 %v2969_v13 }
 0x865   :  { %2603 = vmatmul.mubr.msk.bf16.gmra.mrb[24].mxu1 %vm396_vm3, %v1500_v36 }
 0x914   :  { %v2584_v61 = vpop.f32.mrb[12].mxu1 }
 0x915   :  { %v1286_v49 = vpop.f32.mrb[13].mxu1  ;;  %v1319_v41 = vmax.f32 %v2584_v61, 0.0 }
 0x916   :  { %v2585_v59 = vpop.f32.mrb[14].mxu1  ;;  %v1317_v44 = vmax.f32 %v1286_v49, 0.0 }
 0x917   :  { %v1289_v40 = vpop.f32.mrb[15].mxu1  ;;  %v1320_v7 = vmax.f32 %v2585_v59, 0.0 }
 0x918   :  { %v1318_v18 = vmax.f32 %v1289_v40, 0.0 }
 0x91d   :  { %v3695_v52 = vpop.f32.mrb[16].mxu1 }
 0x91e   :  { %v3697_v30 = vpop.f32.mrb[17].mxu1  ;;  %v1323_v48 = vmax.f32 %v3695_v52, 0.0 }
 0x91f   :  { %v3699_v43 = vpop.f32.mrb[18].mxu1  ;;  %v1321_v49 = vmax.f32 %v3697_v30, 0.0 }
 0x920   :  { %v3701_v8 = vpop.f32.mrb[19].mxu1  ;;  %v1324_v40 = vmax.f32 %v3699_v43, 0.0 }
 0x921   :  { %v1322_v46 = vmax.f32 %v3701_v8, 0.0  ;;  %v2725_v8 = vld [vmem:[%s3999_s3 + $0x30] sm:$0xff]  }
 0x922   :  { %2620 = vmatprep.subr.bf16.mxu1 %v2725_v8 }
 0x923   :  { %2621 = vmatpush3.bf16.msra.mxu1 %v2725_v8 }
 0x930   :  { %v2600_v42 = vpop.f32.mrb[20].mxu1 }
 0x931   :  { %v1563_v60 = vpop.f32.mrb[21].mxu1  ;;  %v1596_v22 = vmax.f32 %v2600_v42, 0.0 }
 0x932   :  { %v2601_v27 = vpop.f32.mrb[22].mxu1  ;;  %v1594_v57 = vmax.f32 %v1563_v60, 0.0 }
 0x933   :  { %v1597_v34 = vmax.f32 %v2601_v27, 0.0  ;;  %v1566_v11 = vpop.f32.mrb[23].mxu1 }
 0x934   :  { %v1595_v25 = vmax.f32 %v1566_v11, 0.0 }
 0x935   :  { %v2702_v55 = vpack.i.bf16 %v1597_v34, %v1596_v22 }
 0x936   :  { %v2697_v39 = vpack.i.bf16 %v1595_v25, %v1594_v57 }
 0x938   :  { %2698 = vrot.lane.b32.xlu1 %v2697_v39, %s2973_s22  ;;  %v2604_v53 = vpop.f32.mrb[24].mxu1 }
 0x939   :  { %v1579_v4 = vpop.f32.mrb[25].mxu1  ;;  %v1600_v16 = vmax.f32 %v2604_v53, 0.0 }
 0x93a   :  { %v2605_v1 = vpop.f32.mrb[26].mxu1  ;;  %v1598_v62 = vmax.f32 %v1579_v4, 0.0 }
 0x93b   :  { %v1601_v29 = vmax.f32 %v2605_v1, 0.0  ;;  %v1582_v47 = vpop.f32.mrb[27].mxu1 }
 0x93c   :  { %v1599_v6 = vmax.f32 %v1582_v47, 0.0  ;;  %2703 = vrot.lane.b32.xlu1 %v2702_v55, %s2973_s22 }
 0x93d   :  { %v2712_v9 = vpack.i.bf16 %v1601_v29, %v1600_v16 }
 0x93e   :  { %v2707_v2 = vpack.i.bf16 %v1599_v6, %v1598_v62 }
 0x940   :  { %2713 = vrot.lane.b32.xlu1 %v2712_v9, %s2973_s22  ;;  %2708 = vrot.lane.b32.xlu0 %v2707_v2, %s2973_s22 }
 0x9aa   :  { %v2699_v21 = vpop.permute.xlu1 %2698 }
 0x9ab   :  { %v2701_v5 = vunpack.i.h.bf16 %v2699_v21  ;;  %v2700_v10 = vunpack.i.l.bf16 %v2699_v21 }
 0x9ad   :  { %v1635_v32 = vsel %vm174_vm0, %v1318_v18, %v2701_v5  ;;  %v1634_v54 = vsel %vm174_vm0, %v1317_v44, %v2700_v10  ;;  %v2974_v18 = vmov 16  }
 0x9ae   :  { %v1642_v12 = vpack.c.bf16 %v1635_v32, %v1634_v54  ;;  %v2704_v45 = vpop.permute.xlu1 %2703  ;;  %2717 = vset.pattern.permute.xlu0 %v2974_v18  ;;  %2718 = vset.pattern.permute.xlu1 %v2974_v18 }
 0x9af   :  { %v2706_v14 = vunpack.i.h.bf16 %v2704_v45  ;;  %v2705_v20 = vunpack.i.l.bf16 %v2704_v45 }
 0x9b0   :  { %2610 = vmatprep.mubr.msk.bf16.mxu0 %vm256_vm2, %v1642_v12 }
 0x9b1   :  { %v1637_v37 = vsel %vm174_vm0, %v1320_v7, %v2706_v14  ;;  %v1636_v36 = vsel %vm174_vm0, %v1319_v41, %v2705_v20 }
 0x9b2   :  { %v1643_v42 = vpack.c.bf16 %v1637_v37, %v1636_v36  ;;  %v2714_v60 = vpop.permute.xlu1 %2713  ;;  %v2709_v61 = vpop.permute.xlu0 %2708  ;;  %v1755_v36 = vld [vmem:[%s3999_s3 + $0x48] sm:$0x1] }
 0x9b3   :  { %v2716_v59 = vunpack.i.h.bf16 %v2714_v60  ;;  %v2715_v27 = vunpack.i.l.bf16 %v2714_v60  ;;  %v2711_v58 = vunpack.i.h.bf16 %v2709_v61  ;;  %v2710_v22 = vunpack.i.l.bf16 %v2709_v61 }
 0x9b4   :  { %2611 = vmatmul.mubr.msk.bf16.vlgmr.msra.gmra.mrb[28].mxu0 %vm256_vm2, %v1643_v42 }
 0x9b5   :  { %v1641_v52 = vsel %vm174_vm0, %v1324_v40, %v2716_v59  ;;  %v1640_v34 = vsel %vm174_vm0, %v1323_v48, %v2715_v27  ;;  %v1639_v11 = vsel %vm174_vm0, %v1322_v46, %v2711_v58  ;;  %v1638_v30 = vsel %vm174_vm0, %v1321_v49, %v2710_v22 }
 0x9b6   :  { %v1645_v43 = vpack.c.bf16 %v1641_v52, %v1640_v34  ;;  %v1644_v57 = vpack.c.bf16 %v1639_v11, %v1638_v30 }
 0x9b8   :  { %2614 = vmatprep.mubr.msk.bf16.mxu0 %vm256_vm2, %v1644_v57 }
 0x9bc   :  { %2615 = vmatmul.mubr.msk.bf16.gmra.mrb[32].mxu0 %vm256_vm2, %v1645_v43 }
 0x9bd   :  { %2638 = vmatprep.mubr.msk.bf16.mxu0 %vm2970_vm1, %v2969_v13 }
 0xa87   :  { %v2612_v25 = vpop.f32.mrb[28].mxu0 }
 0xa88   :  { %v1708_v55 = vpop.f32.mrb[29].mxu0  ;;  %v1741_v53 = vmul.f32 %v2612_v25, %v3053_v38 }
 0xa89   :  { %v2613_v39 = vpop.f32.mrb[30].mxu0  ;;  %v1739_v16 = vmul.f32 %v1708_v55, %v3039_v26 }
 0xa8a   :  { %v1742_v4 = vmul.f32 %v2613_v39, %v3051_v35  ;;  %v1711_v1 = vpop.f32.mrb[31].mxu0 }
 0xa8b   :  { %v1740_v29 = vmul.f32 %v1711_v1, %v3048_v33 }
 0xa8c   :  { %v1748_v47 = vpack.c.bf16 %v1742_v4, %v1741_v53 }
 0xa8d   :  { %v1747_v62 = vpack.c.bf16 %v1740_v29, %v1739_v16 }
 0xa8f   :  { %v2616_v6 = vpop.f32.mrb[32].mxu0  ;;  %2622 = vmatprep.mubr.msk.bf16.mxu1 %vm256_vm2, %v1747_v62 }
 0xa90   :  { %v1724_v3 = vpop.f32.mrb[33].mxu0  ;;  %2623 = vmatmul.mubr.msk.bf16.vlgmr.msra.gmra.mrb[28].mxu1 %vm256_vm2, %v1748_v47  ;;  %v1745_v2 = vmul.f32 %v2616_v6, %v3079_v0 }
 0xa91   :  { %v2617_v9 = vpop.f32.mrb[34].mxu0  ;;  %v1743_v35 = vmul.f32 %v1724_v3, %v3066_v51 }
 0xa92   :  { %v1746_v38 = vmul.f32 %v2617_v9, %v3077_v63  ;;  %v1727_v21 = vpop.f32.mrb[35].mxu0 }
 0xa93   :  { %v1744_v26 = vmul.f32 %v1727_v21, %v3064_v50 }
 0xa94   :  { %v1750_v44 = vpack.c.bf16 %v1746_v38, %v1745_v2 }
 0xa95   :  { %v1749_v33 = vpack.c.bf16 %v1744_v26, %v1743_v35 }
 0xa97   :  { %2626 = vmatprep.mubr.msk.bf16.mxu1 %vm256_vm2, %v1749_v33 }
 0xa98   :  { %2627 = vmatmul.mubr.msk.bf16.gmra.mrb[32].mxu1 %vm256_vm2, %v1750_v44 }
 0xb63   :  { %v2624_v5 = vpop.f32.mrb[28].mxu1 }
 0xb64   :  { %v1814_v10 = vpop.f32.mrb[29].mxu1 }
 0xb65   :  { %1910 = vperm.xlu0 %2717, %v1814_v10   ;;  %v2625_v0 = vpop.f32.mrb[30].mxu1 }
 0xb66   :  { %v1846_v32 = vpack.c.bf16 %v2625_v0, %v2624_v5  ;;  %v1817_v63 = vpop.f32.mrb[31].mxu1 }
 0xb67   :  { %v1845_v54 = vpack.c.bf16 %v1817_v63, %v1814_v10  ;;  %1915 = vperm.xlu1 %2718, %v1817_v63  }
 0xb68   :  { %v1856_v20 = vsel %vm174_vm0, %v1846_v32, 0 }
 0xb69   :  { %1925 = vperm.xlu0 %2717, %v2625_v0   ;;  %2642 = vmatprep.subr.bf16.mxu1 %v1845_v54  ;;  %v1853_v50 = vsel %vm174_vm0, %v1845_v54, 0 }
 0xb6a   :  { %2631 = vmatpush3.bf16.xpose.msra.mxu0 %v1853_v50  ;;  %2643 = vmatpush3.bf16.msra.mxu1 %v1845_v54 }
 0xb6b   :  { %1920 = vperm.xlu1 %2718, %v2624_v5   ;;  %v2628_v51 = vpop.f32.mrb[32].mxu1  ;;  %2644 = vmatprep.subr.bf16.mxu1 %v1846_v32  ;;  %v2926_v5 = vld [vmem:[%s3998_s2 + $0x20] sm:$0xff] }
 0xb6c   :  { %v1830_v12 = vpop.f32.mrb[33].mxu1  ;;  %2632 = vmatprep.subr.bf16.mxu0 %v2969_v13 }
 0xb6d   :  { %v2629_v45 = vpop.f32.mrb[34].mxu1 }
 0xb6e   :  { %v1848_v41 = vpack.c.bf16 %v2629_v45, %v2628_v51  ;;  %v1833_v7 = vpop.f32.mrb[35].mxu1  ;;  %2645 = vmatpush3.bf16.msra.mxu1 %v1846_v32 }
 0xb6f   :  { %v1847_v14 = vpack.c.bf16 %v1833_v7, %v1830_v12  ;;  %1930 = vperm.xlu1 %2718, %v1830_v12   ;;  %1935 = vperm.xlu0 %2717, %v1833_v7  }
 0xb70   :  { %v1862_v37 = vsel %vm174_vm0, %v1848_v41, 0 }
 0xb71   :  { %2646 = vmatprep.subr.bf16.mxu1 %v1847_v14  ;;  %v1859_v48 = vsel %vm174_vm0, %v1847_v14, 0 }
 0xb72   :  { %2633 = vmatpush3.bf16.xpose.msra.mxu0 %v1856_v20  ;;  %2647 = vmatpush3.bf16.msra.mxu1 %v1847_v14 }
 0xb73   :  { %1940 = vperm.xlu1 %2718, %v2628_v51   ;;  %1945 = vperm.xlu0 %2717, %v2629_v45  }
 0xb74   :  { %2648 = vmatprep.subr.bf16.mxu1 %v1848_v41  ;;  %2634 = vmatprep.subr.bf16.mxu0 %v2969_v13 }
 0xb76   :  { %2649 = vmatpush3.bf16.msra.mxu1 %v1848_v41 }
 0xb7a   :  { %2635 = vmatpush3.bf16.xpose.msra.mxu0 %v1859_v48 }
 0xb7b   :  { %2636 = vmatprep.subr.bf16.mxu0 %v2969_v13 }
 0xb82   :  { %2637 = vmatpush3.bf16.xpose.msra.mxu0 %v1862_v37 }
 0xb89   :  { %2639 = vmatmul.mubr.msk.bf16.vlgmr.msra.gmra.mrb[36].mxu0 %vm174_vm0, %v1755_v36 }
 0xbe4   :  { %v1911_v40 = vpop.permute.xlu0 %1910 }
 0xbe6   :  { %v1916_v49 = vpop.permute.xlu1 %1915 }
 0xbe8   :  { %v1926_v42 = vpop.permute.xlu0 %1925 }
 0xbea   :  { %v1921_v46 = vpop.permute.xlu1 %1920 }
 0xbee   :  { %v1931_v60 = vpop.permute.xlu1 %1930  ;;  %v1936_v61 = vpop.permute.xlu0 %1935 }
 0xbf2   :  { %v1941_v13 = vpop.permute.xlu1 %1940  ;;  %v1946_v52 = vpop.permute.xlu0 %1945 }
 0xc5c   :  { %v1898_v59 = vpop.f32.mrb[36].mxu0 }
 0xc5d   :  { %v1907_v27 = vrot.slane %v1898_v59, %v3036_v23  ;;  %v2640_v58 = vpop.f32.mrb[37].mxu0 }
 0xc5e   :  { %v1901_v22 = vpop.f32.mrb[38].mxu0 }
 0xc5f   :  { %v2641_v34 = vpop.f32.mrb[39].mxu0  ;;  %v1949_v11 = vadd.f32 %v1916_v49, %v1907_v27  ;;  %v1948_v30 = vadd.f32 %v1911_v40, %v1907_v27  ;;  %v1950_v43 = vadd.f32 %v1921_v46, %v1907_v27  ;;  %v1951_v57 = vadd.f32 %v1926_v42, %v1907_v27 }
 0xc60   :  { %v1952_v8 = vadd.f32 %v1931_v60, %v1907_v27  ;;  %v1953_v25 = vadd.f32 %v1936_v61, %v1907_v27  ;;  %v1954_v55 = vadd.f32 %v1941_v13, %v1907_v27  ;;  %v1955_v39 = vadd.f32 %v1946_v52, %v1907_v27 }
 0xc61   :  { %vm1957_vm1 = vcmp.gt.f32.partialorder %v1949_v11, 0.0  ;;  %v1965_v53 = vmul.f32 0.2, %v1949_v11  ;;  %vm1956_vm2 = vcmp.gt.f32.partialorder %v1948_v30, 0.0  ;;  %v1964_v4 = vmul.f32 0.2, %v1948_v30 }
 0xc62   :  { %vm1958_vm12 = vcmp.gt.f32.partialorder %v1950_v43, 0.0  ;;  %v1966_v1 = vmul.f32 0.2, %v1950_v43  ;;  %vm1959_vm13 = vcmp.gt.f32.partialorder %v1951_v57, 0.0  ;;  %v1967_v23 = vmul.f32 0.2, %v1951_v57 }
 0xc63   :  { %v1973_v16 = vsel %vm1957_vm1, %v1949_v11, %v1965_v53  ;;  %v1972_v29 = vsel %vm1956_vm2, %v1948_v30, %v1964_v4  ;;  %vm1960_vm14 = vcmp.gt.f32.partialorder %v1952_v8, 0.0  ;;  %v1968_v47 = vmul.f32 0.2, %v1952_v8 }
 0xc64   :  { %v1981_v62 = vadd.f32 %v3454_v56, %v1973_v16  ;;  %v1980_v6 = vadd.f32 %v3462_v31, %v1972_v29  ;;  %v1974_v3 = vsel %vm1958_vm12, %v1950_v43, %v1966_v1  ;;  %v1975_v9 = vsel %vm1959_vm13, %v1951_v57, %v1967_v23 }
 0xc65   :  { %v1982_v2 = vadd.f32 %v3478_v17, %v1974_v3  ;;  %vm1961_vm15 = vcmp.gt.f32.partialorder %v1953_v25, 0.0  ;;  %v1983_v35 = vadd.f32 %v3550_v28, %v1975_v9  ;;  %v1969_v26 = vmul.f32 0.2, %v1953_v25  ;;  %v3815_v3 = vld [vmem:[%s3996_s0 + $0x8] sm:$0xff] }
 0xc66   :  { %v1991_v38 = vsel %vm396_vm3, %v1981_v62, -inf  ;;  %v1988_v21 = vsel %vm396_vm3, %v1980_v6, -inf  ;;  %v1976_v44 = vsel %vm1960_vm14, %v1952_v8, %v1968_v47  ;;  %v1970_v33 = vmul.f32 0.2, %v1954_v55 }
 0xc67   :  { %1992 = vmax.xlane.f32.xlu0 %v1991_v38  ;;  %1989 = vmax.xlane.f32.xlu1 %v1988_v21  ;;  %v1977_v18 = vsel %vm1961_vm15, %v1953_v25, %v1969_v26  ;;  %vm1962_vm4 = vcmp.gt.f32.partialorder %v1954_v55, 0.0  ;;  %vm1963_vm5 = vcmp.gt.f32.partialorder %v1955_v39, 0.0  ;;  %v1971_v56 = vmul.f32 0.2, %v1955_v39  ;;  %v3829_v21 = vld [vmem:[%s3996_s0] sm:$0xff] }
 0xc68   :  { %v1994_v31 = vsel %vm396_vm3, %v1982_v2, -inf  ;;  %v1997_v17 = vsel %vm396_vm3, %v1983_v35, -inf  ;;  %v1984_v10 = vadd.f32 %v2926_v5, %v1976_v44  ;;  %v1985_v28 = vadd.f32 %v3562_v24, %v1977_v18  ;;  %v3839_v18 = vld [vmem:[%s3996_s0 + $0x18] sm:$0xff] }
 0xc69   :  { %v1978_v0 = vsel %vm1962_vm4, %v1954_v55, %v1970_v33  ;;  %v1979_v32 = vsel %vm1963_vm5, %v1955_v39, %v1971_v56  ;;  %v2222_v9 = vmul.f32 %v3815_v3, %v3815_v3  ;;  %v2224_v56 = vmul.f32 %v3839_v18, %v3839_v18 }
 0xc6a   :  { %v2000_v63 = vsel %vm396_vm3, %v1984_v10, -inf  ;;  %v2003_v54 = vsel %vm396_vm3, %v1985_v28, -inf  ;;  %v1986_v50 = vadd.f32 %v3542_v19, %v1978_v0  ;;  %v1987_v51 = vadd.f32 %v3572_v15, %v1979_v32 }
 0xc6b   :  { %1995 = vmax.xlane.f32.xlu0 %v1994_v31  ;;  %1998 = vmax.xlane.f32.xlu1 %v1997_v17  ;;  %v2232_v26 = vsel %vm174_vm0, %v2222_v9, 0.0  ;;  %v2238_v31 = vsel %vm174_vm0, %v2224_v56, 0.0 }
 0xc6c   :  { %v2006_v12 = vsel %vm396_vm3, %v1986_v50, -inf  ;;  %v2009_v45 = vsel %vm396_vm3, %v1987_v51, -inf }
 0xc6f   :  { %2001 = vmax.xlane.f32.xlu0 %v2000_v63  ;;  %2004 = vmax.xlane.f32.xlu1 %v2003_v54 }
 0xc73   :  { %2007 = vmax.xlane.f32.xlu0 %v2006_v12  ;;  %2010 = vmax.xlane.f32.xlu1 %v2009_v45 }
 0xcf4   :  { %v1993_v24 = vpop.xlane.xlu0 %1992  ;;  %v1990_v41 = vpop.xlane.xlu1 %1989 }
 0xcf5   :  { %v2013_v7 = vsub.f32 %v1981_v62, %v1993_v24  ;;  %v2012_v14 = vsub.f32 %v1980_v6, %v1990_v41 }
 0xcf7   :  { %v2022_v20 = vmul.f32 1.442695, %v2013_v7  ;;  %v2020_v48 = vmul.f32 1.442695, %v2012_v14 }
 0xcf8   :  { %v1996_v37 = vpop.xlane.xlu0 %1995  ;;  %v1999_v36 = vpop.xlane.xlu1 %1998 }
 0xcf9   :  { %2854 = vpow2.f32 %v2022_v20  ;;  %v2014_v19 = vsub.f32 %v1982_v2, %v1996_v37  ;;  %v2015_v49 = vsub.f32 %v1983_v35, %v1999_v36  ;;  %v3822_v2 = vld [vmem:[%s3996_s0 + $0x10] sm:$0xff]  ;;  %v2221_v35 = vmul.f32 %v3829_v21, %v3829_v21 }
 0xcfa   :  { %2856 = vpow2.f32 %v2020_v48  ;;  %v2223_v38 = vmul.f32 %v3822_v2, %v3822_v2 }
 0xcfb   :  { %v2024_v15 = vmul.f32 1.442695, %v2014_v19  ;;  %v2026_v40 = vmul.f32 1.442695, %v2015_v49  ;;  %v2229_v44 = vsel %vm174_vm0, %v2221_v35, 0.0  ;;  %v3896_v35 = vld [vmem:[%s3996_s0 + $0x30] sm:$0xff] }
 0xcfc   :  { %v2002_v46 = vpop.xlane.xlu0 %2001  ;;  %v2005_v42 = vpop.xlane.xlu1 %2004  ;;  %v2235_v33 = vsel %vm174_vm0, %v2223_v38, 0.0 }
 0xcfd   :  { %2858 = vpow2.f32 %v2024_v15  ;;  %v2016_v60 = vsub.f32 %v1984_v10, %v2002_v46  ;;  %v2017_v61 = vsub.f32 %v1985_v28, %v2005_v42 }
 0xcfe   :  { %2860 = vpow2.f32 %v2026_v40 }
 0xcff   :  { %v2028_v59 = vmul.f32 1.442695, %v2016_v60  ;;  %v2030_v27 = vmul.f32 1.442695, %v2017_v61 }
 0xd00   :  { %v2008_v58 = vpop.xlane.xlu0 %2007  ;;  %v2011_v13 = vpop.xlane.xlu1 %2010 }
 0xd01   :  { %2862 = vpow2.f32 %v2028_v59  ;;  %v2018_v22 = vsub.f32 %v1986_v50, %v2008_v58  ;;  %v2019_v52 = vsub.f32 %v1987_v51, %v2011_v13 }
 0xd02   :  { %2864 = vpow2.f32 %v2030_v27 }
 0xd03   :  { %v3780_v34 = vpop.eup %2854  ;;  %v2032_v11 = vmul.f32 1.442695, %v2018_v22  ;;  %v2034_v30 = vmul.f32 1.442695, %v2019_v52 }
 0xd04   :  { %v3782_v43 = vpop.eup %2856  ;;  %v2039_v57 = vsel %vm396_vm3, %v3780_v34, 0.0 }
 0xd05   :  { %2866 = vpow2.f32 %v2032_v11  ;;  %2040 = vadd.xlane.f32.xlu1 %v2039_v57  ;;  %v2036_v8 = vsel %vm396_vm3, %v3782_v43, 0.0 }
 0xd06   :  { %2868 = vpow2.f32 %v2034_v30  ;;  %2037 = vadd.xlane.f32.xlu0 %v2036_v8  ;;  %v3859_v30 = vld [vmem:[%s3996_s0 + $0x20] sm:$0xff] }
 0xd07   :  { %v3788_v25 = vpop.eup %2858 }
 0xd08   :  { %v3790_v55 = vpop.eup %2860  ;;  %v2042_v39 = vsel %vm396_vm3, %v3788_v25, 0.0 }
 0xd09   :  { %v2045_v53 = vsel %vm396_vm3, %v3790_v55, 0.0 }
 0xd0a   :  { %2043 = vadd.xlane.f32.xlu0 %v2042_v39  ;;  %2046 = vadd.xlane.f32.xlu1 %v2045_v53 }
 0xd0b   :  { %v3796_v4 = vpop.eup %2862 }
 0xd0c   :  { %v3798_v1 = vpop.eup %2864  ;;  %v2048_v23 = vsel %vm396_vm3, %v3796_v4, 0.0 }
 0xd0d   :  { %v2051_v16 = vsel %vm396_vm3, %v3798_v1, 0.0 }
 0xd0e   :  { %2049 = vadd.xlane.f32.xlu0 %v2048_v23  ;;  %2052 = vadd.xlane.f32.xlu1 %v2051_v16  ;;  %v3882_v16 = vld [vmem:[%s3996_s0 + $0x28] sm:$0xff] }
 0xd0f   :  { %v3804_v29 = vpop.eup %2866 }
 0xd10   :  { %v3806_v47 = vpop.eup %2868  ;;  %v2054_v62 = vsel %vm396_vm3, %v3804_v29, 0.0 }
 0xd11   :  { %v2057_v6 = vsel %vm396_vm3, %v3806_v47, 0.0 }
 0xd12   :  { %2055 = vadd.xlane.f32.xlu0 %v2054_v62  ;;  %2058 = vadd.xlane.f32.xlu1 %v2057_v6 }
 0xd16   :  { %2233 = vadd.xlane.f32.xlu1 %v2232_v26  ;;  %2230 = vadd.xlane.f32.xlu0 %v2229_v44  ;;  %v2227_v26 = vmul.f32 %v3896_v35, %v3896_v35 }
 0xd1a   :  { %2236 = vadd.xlane.f32.xlu1 %v2235_v33 }
 0xd1e   :  { %2239 = vadd.xlane.f32.xlu1 %v2238_v31 }
 0xd92   :  { %v2041_v17 = vpop.xlane.xlu1 %2040 }
 0xd93   :  { %v2038_v5 = vpop.xlane.xlu0 %2037  ;;  %v2061_v10 = vmax.f32 %v2041_v17, 1e-20 }
 0xd94   :  { %v2060_v28 = vmax.f32 %v2038_v5, 1e-20  ;;  %v2247_v5 = vsel %vm174_vm0, %v2227_v26, 0.0 }
 0xd95   :  { %2870 = vrcp.f32 %v2061_v10  ;;  %v3913_v10 = vld [vmem:[%s3996_s0 + $0x38] sm:$0xff] }
 0xd96   :  { %2872 = vrcp.f32 %v2060_v28  ;;  %v2228_v28 = vmul.f32 %v3913_v10, %v3913_v10 }
 0xd97   :  { %v2044_v0 = vpop.xlane.xlu0 %2043  ;;  %v2047_v32 = vpop.xlane.xlu1 %2046 }
 0xd98   :  { %v2062_v63 = vmax.f32 %v2044_v0, 1e-20  ;;  %v2063_v54 = vmax.f32 %v2047_v32, 1e-20 }
 0xd9a   :  { %2874 = vrcp.f32 %v2062_v63  ;;  %v2250_v63 = vsel %vm174_vm0, %v2228_v28, 0.0 }
 0xd9b   :  { %2876 = vrcp.f32 %v2063_v54  ;;  %v2050_v50 = vpop.xlane.xlu0 %2049  ;;  %v2053_v51 = vpop.xlane.xlu1 %2052 }
 0xd9c   :  { %v2064_v12 = vmax.f32 %v2050_v50, 1e-20  ;;  %v2065_v45 = vmax.f32 %v2053_v51, 1e-20 }
 0xd9e   :  { %2878 = vrcp.f32 %v2064_v12 }
 0xd9f   :  { %v2871_v24 = vpop.eup %2870  ;;  %2880 = vrcp.f32 %v2065_v45  ;;  %v2056_v41 = vpop.xlane.xlu0 %2055 }
 0xda0   :  { %v2059_v7 = vpop.xlane.xlu1 %2058  ;;  %v2873_v14 = vpop.eup %2872  ;;  %v2066_v20 = vmax.f32 %v2056_v41, 1e-20  ;;  %v2077_v37 = vmul.f32 %v2871_v24, %v3780_v34 }
 0xda1   :  { %v2067_v48 = vmax.f32 %v2059_v7, 1e-20  ;;  %v2076_v36 = vmul.f32 %v2873_v14, %v3782_v43  ;;  %v2225_v43 = vmul.f32 %v3859_v30, %v3859_v30 }
 0xda2   :  { %2882 = vrcp.f32 %v2066_v20 }
 0xda3   :  { %2884 = vrcp.f32 %v2067_v48  ;;  %v2084_v19 = vpack.c.bf16 %v2077_v37, %v2076_v36  ;;  %v2241_v57 = vsel %vm174_vm0, %v2225_v43, 0.0  ;;  %v2231_v14 = vpop.xlane.xlu0 %2230 }
 0xda4   :  { %v2875_v49 = vpop.eup %2874  ;;  %2242 = vadd.xlane.f32.xlu1 %v2241_v57  ;;  %v2234_v24 = vpop.xlane.xlu1 %2233  ;;  %v2253_v37 = vmax.f32 %v2231_v14, 1e-24 }
 0xda5   :  { %v2877_v15 = vpop.eup %2876  ;;  %v2078_v40 = vmul.f32 %v2875_v49, %v3788_v25  ;;  %2650 = vmatprep.mubr.msk.bf16.mxu1 %vm396_vm3, %v2084_v19  ;;  %v2254_v48 = vmax.f32 %v2234_v24, 1e-24 }
 0xda6   :  { %v2079_v46 = vmul.f32 %v2877_v15, %v3790_v55 }
 0xda7   :  { %2886 = vrsqrt.f32 %v2254_v48 }
 0xda8   :  { %v2879_v42 = vpop.eup %2878  ;;  %v2085_v60 = vpack.c.bf16 %v2079_v46, %v2078_v40  ;;  %v2237_v41 = vpop.xlane.xlu1 %2236  ;;  %2888 = vrsqrt.f32 %v2253_v37 }
 0xda9   :  { %v2881_v61 = vpop.eup %2880  ;;  %v2080_v59 = vmul.f32 %v2879_v42, %v3796_v4  ;;  %v2255_v36 = vmax.f32 %v2237_v41, 1e-24 }
 0xdaa   :  { %2651 = vmatmul.mubr.msk.bf16.vlgmr.msra.gmra.mrb[36].mxu1 %vm396_vm3, %v2085_v60  ;;  %v2081_v27 = vmul.f32 %v2881_v61, %v3798_v1 }
 0xdab   :  { %2890 = vrsqrt.f32 %v2255_v36 }
 0xdac   :  { %v2883_v58 = vpop.eup %2882  ;;  %v2086_v13 = vpack.c.bf16 %v2081_v27, %v2080_v59  ;;  %v2240_v7 = vpop.xlane.xlu1 %2239 }
 0xdad   :  { %v2885_v22 = vpop.eup %2884  ;;  %v2082_v52 = vmul.f32 %v2883_v58, %v3804_v29  ;;  %v2226_v29 = vmul.f32 %v3882_v16, %v3882_v16  ;;  %v2256_v40 = vmax.f32 %v2240_v7, 1e-24 }
 0xdae   :  { %2654 = vmatprep.mubr.msk.bf16.mxu1 %vm396_vm3, %v2086_v13  ;;  %v2083_v34 = vmul.f32 %v2885_v22, %v3806_v47 }
 0xdaf   :  { %v2244_v38 = vsel %vm174_vm0, %v2226_v29, 0.0 }
 0xdb0   :  { %v2087_v11 = vpack.c.bf16 %v2083_v34, %v2082_v52 }
 0xdb1   :  { %v2887_v22 = vpop.eup %2886 }
 0xdb2   :  { %2655 = vmatmul.mubr.msk.bf16.gmra.mrb[40].mxu1 %vm396_vm3, %v2087_v11  ;;  %v2889_v11 = vpop.eup %2888  ;;  %v2270_v29 = vmul.f32 %v3815_v3, %v2887_v22  ;;  %vm2356_vm3 = vcmask 0  }
 0xdb5   :  { %v2891_v57 = vpop.eup %2890 }
 0xe31   :  { %v2243_v20 = vpop.xlane.xlu1 %2242 }
 0xe32   :  { %v2257_v58 = vmax.f32 %v2243_v20, 1e-24 }
 0xe7d   :  { %v3864_v8 = vpop.f32.mrb[36].mxu1 }
 0xe7e   :  { %v2167_v25 = vmul.f32 %v3864_v8, %v3864_v8  ;;  %v3868_v55 = vpop.f32.mrb[37].mxu1 }
 0xe7f   :  { %v3870_v39 = vpop.f32.mrb[38].mxu1  ;;  %v2165_v53 = vmul.f32 %v3868_v55, %v3868_v55 }
 0xe80   :  { %v3874_v4 = vpop.f32.mrb[39].mxu1  ;;  %v2179_v1 = vsel %vm174_vm0, %v2167_v25, 0.0  ;;  %v2168_v62 = vmul.f32 %v3870_v39, %v3870_v39 }
 0xe81   :  { %v2166_v23 = vmul.f32 %v3874_v4, %v3874_v4  ;;  %2180 = vadd.xlane.f32.xlu0 %v2179_v1  ;;  %v2173_v6 = vsel %vm174_vm0, %v2165_v53, 0.0 }
 0xe82   :  { %v2182_v17 = vsel %vm174_vm0, %v2168_v62, 0.0 }
 0xe83   :  { %v2176_v47 = vsel %vm174_vm0, %v2166_v23, 0.0 }
 0xe84   :  { %2177 = vadd.xlane.f32.xlu1 %v2176_v47  ;;  %v2269_v47 = vmul.f32 %v3829_v21, %v2889_v11 }
 0xe85   :  { %2174 = vadd.xlane.f32.xlu0 %v2173_v6  ;;  %v3890_v9 = vpop.f32.mrb[40].mxu1 }
 0xe86   :  { %v3900_v44 = vpop.f32.mrb[41].mxu1  ;;  %v2171_v56 = vmul.f32 %v3890_v9, %v3890_v9 }
 0xe87   :  { %v3902_v33 = vpop.f32.mrb[42].mxu1  ;;  %v2169_v0 = vmul.f32 %v3900_v44, %v3900_v44 }
 0xe88   :  { %v3906_v31 = vpop.f32.mrb[43].mxu1  ;;  %2245 = vadd.xlane.f32.xlu1 %v2244_v38  ;;  %v2191_v32 = vsel %vm174_vm0, %v2171_v56, 0.0  ;;  %v2172_v51 = vmul.f32 %v3902_v33, %v3902_v33 }
 0xe89   :  { %2183 = vadd.xlane.f32.xlu0 %v2182_v17  ;;  %v2170_v54 = vmul.f32 %v3906_v31, %v3906_v31  ;;  %v2185_v50 = vsel %vm174_vm0, %v2169_v0, 0.0  ;;  %v2271_v0 = vmul.f32 %v3822_v2, %v2891_v57 }
 0xe8a   :  { %v2194_v45 = vsel %vm174_vm0, %v2172_v51, 0.0 }
 0xe8b   :  { %v2188_v12 = vsel %vm174_vm0, %v2170_v54, 0.0 }
 0xe8c   :  { %2248 = vadd.xlane.f32.xlu1 %v2247_v5 }
 0xe8d   :  { %2192 = vadd.xlane.f32.xlu0 %v2191_v32 }
 0xe90   :  { %2251 = vadd.xlane.f32.xlu1 %v2250_v63 }
 0xe91   :  { %2186 = vadd.xlane.f32.xlu0 %v2185_v50 }
 0xe95   :  { %2189 = vadd.xlane.f32.xlu0 %v2188_v12 }
 0xe99   :  { %2195 = vadd.xlane.f32.xlu0 %v2194_v45 }
 0xf0e   :  { %v2181_v19 = vpop.xlane.xlu0 %2180 }
 0xf0f   :  { %v2199_v49 = vmax.f32 %v2181_v19, 1e-24 }
 0xf11   :  { %v2178_v15 = vpop.xlane.xlu1 %2177  ;;  %2892 = vrsqrt.f32 %v2199_v49 }
 0xf12   :  { %v2198_v46 = vmax.f32 %v2178_v15, 1e-24  ;;  %v2175_v42 = vpop.xlane.xlu0 %2174 }
 0xf13   :  { %v2197_v60 = vmax.f32 %v2175_v42, 1e-24 }
 0xf14   :  { %2894 = vrsqrt.f32 %v2198_v46 }
 0xf15   :  { %2896 = vrsqrt.f32 %v2197_v60  ;;  %v2246_v61 = vpop.xlane.xlu1 %2245 }
 0xf16   :  { %2898 = vrsqrt.f32 %v2256_v40  ;;  %v2184_v59 = vpop.xlane.xlu0 %2183  ;;  %v2258_v6 = vmax.f32 %v2246_v61, 1e-24 }
 0xf17   :  { %v2200_v27 = vmax.f32 %v2184_v59, 1e-24 }
 0xf19   :  { %2900 = vrsqrt.f32 %v2200_v27  ;;  %v2249_v13 = vpop.xlane.xlu1 %2248 }
 0xf1a   :  { %v2193_v52 = vpop.xlane.xlu0 %2192  ;;  %v2259_v34 = vmax.f32 %v2249_v13, 1e-24  ;;  %2902 = vrsqrt.f32 %v2257_v58 }
 0xf1b   :  { %v2203_v43 = vmax.f32 %v2193_v52, 1e-24  ;;  %v2893_v25 = vpop.eup %2892 }
 0xf1c   :  { %2904 = vrsqrt.f32 %v2259_v34  ;;  %v2215_v28 = vmul.f32 %v2893_v25, %v3864_v8  ;;  %v2935_v25 = vld [vmem:[%s3997_s1 + $0x8] sm:$0xff] }
 0xf1d   :  { %v2252_v53 = vpop.xlane.xlu1 %2251  ;;  %2906 = vrsqrt.f32 %v2203_v43 }
 0xf1e   :  { %v2895_v1 = vpop.eup %2894  ;;  %v2187_v23 = vpop.xlane.xlu0 %2186  ;;  %v2260_v5 = vmax.f32 %v2252_v53, 1e-24  ;;  %v2936_v53 = vld [vmem:[%s3997_s1] sm:$0xff] }
 0xf1f   :  { %v2897_v62 = vpop.eup %2896  ;;  %v2201_v38 = vmax.f32 %v2187_v23, 1e-24  ;;  %v2214_v26 = vmul.f32 %v2895_v1, %v3874_v4 }
 0xf20   :  { %v2899_v56 = vpop.eup %2898  ;;  %v2213_v17 = vmul.f32 %v2897_v62, %v3868_v55  ;;  %v2279_v55 = vmul.f32 %v2271_v0, %v2215_v28  ;;  %v2938_v0 = vld [vmem:[%s3997_s1 + $0x18] sm:$0xff] }
 0xf21   :  { %2908 = vrsqrt.f32 %v2201_v38  ;;  %v2278_v32 = vmul.f32 %v2270_v29, %v2214_v26  ;;  %v2272_v51 = vmul.f32 %v3839_v18, %v2899_v56 }
 0xf22   :  { %v2190_v63 = vpop.xlane.xlu0 %2189  ;;  %v2277_v3 = vmul.f32 %v2269_v47, %v2213_v17  ;;  %2910 = vrsqrt.f32 %v2258_v6  ;;  %v2291_v7 = vsel %vm174_vm0, %v2279_v55, 0.0  ;;  %v2937_v47 = vld [vmem:[%s3997_s1 + $0x10] sm:$0xff] }
 0xf23   :  { %v2901_v54 = vpop.eup %2900  ;;  %v2202_v21 = vmax.f32 %v2190_v63, 1e-24  ;;  %v2288_v50 = vsel %vm174_vm0, %v2278_v32, 0.0  ;;  %2912 = vrsqrt.f32 %v2260_v5 }
 0xf24   :  { %2289 = vadd.xlane.f32.xlu1 %v2288_v50  ;;  %v2285_v4 = vsel %vm174_vm0, %v2277_v3, 0.0  ;;  %v2216_v8 = vmul.f32 %v2901_v54, %v3870_v39  ;;  %v2903_v45 = vpop.eup %2902  ;;  %v2939_v50 = vld [vmem:[%s3997_s1 + $0x20] sm:$0xff] }
 0xf25   :  { %2914 = vrsqrt.f32 %v2202_v21  ;;  %2286 = vadd.xlane.f32.xlu0 %v2285_v4  ;;  %v2273_v39 = vmul.f32 %v3859_v30, %v2903_v45 }
 0xf26   :  { %v2196_v2 = vpop.xlane.xlu0 %2195  ;;  %v2280_v12 = vmul.f32 %v2272_v51, %v2216_v8  ;;  %v2905_v41 = vpop.eup %2904 }
 0xf27   :  { %v2204_v24 = vmax.f32 %v2196_v2, 1e-24  ;;  %v2907_v20 = vpop.eup %2906  ;;  %v2275_v36 = vmul.f32 %v3896_v35, %v2905_v41 }
 0xf28   :  { %v2294_v14 = vsel %vm174_vm0, %v2280_v12, 0.0  ;;  %v2219_v37 = vmul.f32 %v2907_v20, %v3890_v9  ;;  %v2941_v20 = vld [vmem:[%s3997_s1 + $0x28] sm:$0xff] }
 0xf29   :  { %2916 = vrsqrt.f32 %v2204_v24  ;;  %2292 = vadd.xlane.f32.xlu0 %v2291_v7  ;;  %2295 = vadd.xlane.f32.xlu1 %v2294_v14  ;;  %v2940_v7 = vld [vmem:[%s3997_s1 + $0x30] sm:$0xff] }
 0xf2a   :  { %v2283_v61 = vmul.f32 %v2275_v36, %v2219_v37 }
 0xf2b   :  { %v2909_v18 = vpop.eup %2908 }
 0xf2c   :  { %v2217_v48 = vmul.f32 %v2909_v18, %v3900_v44  ;;  %v2911_v19 = vpop.eup %2910  ;;  %v2303_v35 = vsel %vm174_vm0, %v2283_v61, 0.0 }
 0xf2d   :  { %v2913_v49 = vpop.eup %2912  ;;  %v2274_v60 = vmul.f32 %v3882_v16, %v2911_v19 }
 0xf2e   :  { %v2281_v15 = vmul.f32 %v2273_v39, %v2217_v48  ;;  %v2276_v44 = vmul.f32 %v3913_v10, %v2913_v49 }
 0xf2f   :  { %v2915_v40 = vpop.eup %2914 }
 0xf30   :  { %v2297_v46 = vsel %vm174_vm0, %v2281_v15, 0.0  ;;  %v2218_v42 = vmul.f32 %v2915_v40, %v3906_v31  ;;  %v2942_v15 = vld [vmem:[%s3997_s1 + $0x38] sm:$0xff]  ;;  %s2947_s1 = scalar_lea.vmem %s2365_s29, 32 }
 0xf31   :  { %2298 = vadd.xlane.f32.xlu0 %v2297_v46  ;;  %p2949_p2 = scmp.lt.s32.totalorder %s2947_s1, %s2943_s30 }
 0xf32   :  { %v2282_v59 = vmul.f32 %v2274_v60, %v2218_v42 }
 0xf33   :  { %v2917_v30 = vpop.eup %2916  ;;  %p2950_p3 = por %p2949_p2, %p2948_p1 }
 0xf34   :  { %v2300_v9 = vsel %vm174_vm0, %v2282_v59, 0.0  ;;  %v2220_v27 = vmul.f32 %v2917_v30, %v3902_v33 }
 0xf35   :  { %2301 = vadd.xlane.f32.xlu1 %v2300_v9  ;;  %2304 = vadd.xlane.f32.xlu0 %v2303_v35  ;;  %p2951_p4 = pnand %p2950_p3, %p2944_p0 }
 0xf36   :  { %v2284_v58 = vmul.f32 %v2276_v44, %v2220_v27 }
 0xf38   :  { %v2306_v13 = vsel %vm174_vm0, %v2284_v58, 0.0  ;;  %vm2333_vm0 = vcmask 7168  }
 0xf39   :  { %2307 = vadd.xlane.f32.xlu1 %v2306_v13 }
 0xfb1   :  { %v2290_v31 = vpop.xlane.xlu1 %2289 }
 0xfb2   :  { %v2310_v16 = vsub.f32 1.0, %v2290_v31  ;;  %v2287_v22 = vpop.xlane.xlu0 %2286 }
 0xfb3   :  { %v2309_v52 = vsub.f32 1.0, %v2287_v22 }
 0xfb4   :  { %v2318_v34 = vmul.f32 %v2310_v16, %v2310_v16 }
 0xfb5   :  { %v2317_v11 = vmul.f32 %v2309_v52, %v2309_v52 }
 0xfb6   :  { %v2293_v10 = vpop.xlane.xlu0 %2292  ;;  %v2296_v43 = vpop.xlane.xlu1 %2295  ;;  %v2326_v33 = vmul.f32 %v2935_v25, %v2318_v34 }
 0xfb7   :  { %v2311_v57 = vsub.f32 1.0, %v2293_v10  ;;  %v2325_v1 = vmul.f32 %v2936_v53, %v2317_v11  ;;  %v2312_v29 = vsub.f32 1.0, %v2296_v43 }
 0xfb8   :  { %v2335_v6 = vsel %vm2333_vm0, %v2326_v33, 0.0 }
 0xfb9   :  { %v2319_v23 = vmul.f32 %v2311_v57, %v2311_v57  ;;  %v2334_v38 = vsel %vm2333_vm0, %v2325_v1, 0.0  ;;  %v2320_v26 = vmul.f32 %v2312_v29, %v2312_v29 }
 0xfba   :  { %v2336_v28 = vadd.f32 %v2335_v6, %v2334_v38 }
 0xfbb   :  { %v2327_v62 = vmul.f32 %v2937_v47, %v2319_v23  ;;  %v2328_v32 = vmul.f32 %v2938_v0, %v2320_v26 }
 0xfbd   :  { %v2337_v17 = vsel %vm2333_vm0, %v2327_v62, 0.0  ;;  %v2339_v8 = vsel %vm2333_vm0, %v2328_v32, 0.0 }
 0xfbe   :  { %v2299_v56 = vpop.xlane.xlu0 %2298  ;;  %v2338_v3 = vadd.f32 %v2337_v17, %v2336_v28 }
 0xfbf   :  { %v2313_v5 = vsub.f32 1.0, %v2299_v56 }
 0xfc0   :  { %v2340_v24 = vadd.f32 %v2339_v8, %v2338_v3 }
 0xfc1   :  { %v2321_v63 = vmul.f32 %v2313_v5, %v2313_v5 }
 0xfc2   :  { %v2305_v54 = vpop.xlane.xlu0 %2304  ;;  %v2302_v21 = vpop.xlane.xlu1 %2301 }
 0xfc3   :  { %v2329_v51 = vmul.f32 %v2939_v50, %v2321_v63  ;;  %v2315_v4 = vsub.f32 1.0, %v2305_v54  ;;  %v2314_v55 = vsub.f32 1.0, %v2302_v21 }
 0xfc5   :  { %v2341_v2 = vsel %vm2333_vm0, %v2329_v51, 0.0  ;;  %v2323_v12 = vmul.f32 %v2315_v4, %v2315_v4  ;;  %v2322_v45 = vmul.f32 %v2314_v55, %v2314_v55 }
 0xfc6   :  { %v2308_v41 = vpop.xlane.xlu1 %2307  ;;  %v2342_v39 = vadd.f32 %v2341_v2, %v2340_v24 }
 0xfc7   :  { %v2331_v14 = vmul.f32 %v2940_v7, %v2323_v12  ;;  %v2330_v18 = vmul.f32 %v2941_v20, %v2322_v45  ;;  %v2316_v48 = vsub.f32 1.0, %v2308_v41 }
 0xfc9   :  { %v2343_v37 = vsel %vm2333_vm0, %v2330_v18, 0.0  ;;  %v2324_v36 = vmul.f32 %v2316_v48, %v2316_v48  ;;  %v2345_v49 = vsel %vm2333_vm0, %v2331_v14, 0.0 }
 0xfca   :  { %v2344_v19 = vadd.f32 %v2343_v37, %v2342_v39 }
 0xfcb   :  { %v2332_v40 = vmul.f32 %v2942_v15, %v2324_v36 }
 0xfcc   :  { %v2346_v46 = vadd.f32 %v2345_v49, %v2344_v19 }
 0xfcd   :  { %v2347_v42 = vsel %vm2333_vm0, %v2332_v40, 0.0 }
 0xfce   :  { %v2348_v60 = vadd.f32 %v2347_v42, %v2346_v46 }
 0xfd0   :  { %v2349_v61 = vrot.slane %v2348_v60, 4 }
 0xfd2   :  { %v2350_v59 = vadd.f32 %v2349_v61, %v2348_v60 }
 0xfd4   :  { %v2351_v44 = vrot.slane %v2350_v59, 2 }
 0xfd6   :  { %v2352_v30 = vadd.f32 %v2351_v44, %v2350_v59 }
 0xfd8   :  { %v2353_v9 = vrot.slane %v2352_v30, 1 }
 0xfda   :  { %v2354_v35 = vadd.f32 %v2353_v9, %v2352_v30 }
 0xfdc   :  { %v2355_v27 = vmul.f32 0.05263158, %v2354_v35 }
 0xfde   :  { %2357 = vst.msk [vmem:[#allocation2] sm:$0x1] %vm2356_vm3, %v2355_v27 }
 0xfdf   :  { %2954 = shalt.err (!%p2951_p4)
}
 0xfe0   :  { %s2955_s7 = scalar_lea.hbm %s4000_s4, 16 }
 0xfe1   :  { %p2956_p5 = scmp.ne.s32.totalorder %s4000_s4, %s2955_s7  ;;  %p2959_p6 = scmp.lt.u32.totalorder %s2955_s7, %s4000_s4 }
 0xfe3   :  { %p2961_p7 = pnand %p2959_p6, %p2956_p5 }
 0xfe5   :  { %2964 = shalt.err (!%p2961_p7)
}
 0xfe6   :  { %2367 = dma.vmem_to_hbm [thread:$0]  %s2365_s29, 16, %s4000_s4, [#allocation3]  }
 0xfe7   :  { %2965 = dma.done.wait [#allocation3], 16  }
 0xfe8   :  { %2966 = vsyncadd [#allocation3], 4294967280 }
 0xfe9   :  { %2371 = vsyncpa [#allocation3], 1 }

</bundles_post_ra>
